<compile_context>
chip_gen: v6e
topology: v6e:2x2x1
jax: 0.10.0
libtpu: 0.0.40
codegen_flags: <defaults>
</compile_context>

<pallas_src>
import functools
import math

import jax
import jax.numpy as jnp
from jax.experimental import pallas as pl
from jax.experimental.pallas import tpu as pltpu

_INV_SQRT2 = 1.0 / math.sqrt(2.0)
_LN_EPS = 1e-6


# ---------------------------------------------------------------------------
# small helpers
# ---------------------------------------------------------------------------

def _gelu(x):
    # exact GELU (matches torch.nn.GELU default), fp32
    return 0.5 * x * (1.0 + jax.lax.erf(x * _INV_SQRT2))


def _layernorm(x, g, b, eps):
    mu = jnp.mean(x, axis=-1, keepdims=True)
    var = jnp.mean(jnp.square(x - mu), axis=-1, keepdims=True)
    return (x - mu) * jax.lax.rsqrt(var + eps) * g + b


def _pick_tile(dim, pref, align):
    """Largest divisor of `dim` that is <= pref and a multiple of `align`,
    falling back to the full dim (valid BlockSpec either way)."""
    if dim <= pref:
        return dim
    t = pref - (pref % align)
    while t >= align:
        if dim % t == 0:
            return t
        t -= align
    return dim


# ---------------------------------------------------------------------------
# Kernel 1: generic tiled matmul (+bias) with f32 accumulator (patch embed)
# ---------------------------------------------------------------------------

def _matmul_kernel(x_ref, w_ref, b_ref, o_ref, acc_ref):
    @pl.when(pl.program_id(2) == 0)
    def _():
        acc_ref[...] = jnp.zeros_like(acc_ref)

    acc_ref[...] += jnp.dot(x_ref[...].astype(jnp.bfloat16), w_ref[...],
                            preferred_element_type=jnp.float32)

    @pl.when(pl.program_id(2) == pl.num_programs(2) - 1)
    def _():
        o_ref[...] = acc_ref[...] + b_ref[...]


def pallas_linear(x, w, b, tm=256, tn=256, tk=512):
    """x: (M, K) @ w: (K, N) + b -> (M, N), bf16 MXU inputs, f32 accumulation."""
    M, K = x.shape
    N = w.shape[1]
    tm = _pick_tile(M, tm, 8)
    tn = _pick_tile(N, tn, 128)
    tk = _pick_tile(K, tk, 128)
    return pl.pallas_call(
        _matmul_kernel,
        out_shape=jax.ShapeDtypeStruct((M, N), jnp.float32),
        grid=(M // tm, N // tn, K // tk),
        in_specs=[
            pl.BlockSpec((tm, tk), lambda i, j, k: (i, k)),
            pl.BlockSpec((tk, tn), lambda i, j, k: (k, j)),
            pl.BlockSpec((1, tn), lambda i, j, k: (0, j)),
        ],
        out_specs=pl.BlockSpec((tm, tn), lambda i, j, k: (i, j)),
        scratch_shapes=[pltpu.VMEM((tm, tn), jnp.float32)],
        compiler_params=pltpu.CompilerParams(
            dimension_semantics=("parallel", "parallel", "arbitrary")),
    )(x, w.astype(jnp.bfloat16), b.reshape(1, N).astype(jnp.float32))


# ---------------------------------------------------------------------------
# Kernel 2: fused residual-add + LayerNorm + matmul  (prenorm LN1 -> QKV,
#           and final norm -> classification head). Emits fp32 residual too.
# ---------------------------------------------------------------------------

def _add_ln_matmul_kernel(x_ref, r_ref, g_ref, be_ref, w_ref, b_ref,
                          o_ref, nr_ref, *, eps):
    r = x_ref[...] + r_ref[...]
    nr_ref[...] = r                                   # residual_in_fp32
    y = _layernorm(r, g_ref[...], be_ref[...], eps)
    o_ref[...] = (jnp.dot(y.astype(jnp.bfloat16), w_ref[...],
                          preferred_element_type=jnp.float32) + b_ref[...])


def pallas_add_ln_matmul(x, res, gamma, beta, w, b, tm=256):
    M, D = x.shape
    N = w.shape[1]
    tm = _pick_tile(M, tm, 8)
    return pl.pallas_call(
        functools.partial(_add_ln_matmul_kernel, eps=_LN_EPS),
        out_shape=(jax.ShapeDtypeStruct((M, N), jnp.float32),
                   jax.ShapeDtypeStruct((M, D), jnp.float32)),
        grid=(M // tm,),
        in_specs=[
            pl.BlockSpec((tm, D), lambda i: (i, 0)),
            pl.BlockSpec((tm, D), lambda i: (i, 0)),
            pl.BlockSpec((1, D), lambda i: (0, 0)),
            pl.BlockSpec((1, D), lambda i: (0, 0)),
            pl.BlockSpec((D, N), lambda i: (0, 0)),
            pl.BlockSpec((1, N), lambda i: (0, 0)),
        ],
        out_specs=(pl.BlockSpec((tm, N), lambda i: (i, 0)),
                   pl.BlockSpec((tm, D), lambda i: (i, 0))),
        compiler_params=pltpu.CompilerParams(dimension_semantics=("parallel",)),
    )(x, res, gamma.reshape(1, D), beta.reshape(1, D),
      w.astype(jnp.bfloat16), b.reshape(1, N))


# ---------------------------------------------------------------------------
# Kernel 3: fused multi-head attention + out-proj + residual-add + LayerNorm2.
#           Consumes the fused (S, 3D) QKV slab directly (lane layout
#           [Q(all heads) | K(all heads) | V]); heads sliced on the lane axis.
#           The attention output never leaves VMEM before LN2.
# ---------------------------------------------------------------------------

def _mha_out_ln_kernel(qkv_ref, r_ref, wo_ref, bo_ref, g_ref, be_ref,
                       y_ref, nr_ref, *, num_heads, scale, q_rows, eps):
    qkv = qkv_ref[0]                                  # (S, 3D) fp32
    D = qkv.shape[-1] // 3
    dh = D // num_heads
    Sq = qkv.shape[0] if q_rows is None else q_rows   # cross-attn: CLS row only
    outs = []
    for h in range(num_heads):
        lo = h * dh
        # scale Q on the small (Sq, dh) tile instead of the (Sq, Sk) scores
        q = (qkv[:Sq, lo:lo + dh] * scale).astype(jnp.bfloat16)
        k = qkv[:, D + lo:D + lo + dh].astype(jnp.bfloat16)
        v = qkv[:, 2 * D + lo:2 * D + lo + dh].astype(jnp.bfloat16)
        s = jax.lax.dot_general(q, k, (((1,), (1,)), ((), ())),
                                preferred_element_type=jnp.float32)
        m = jnp.max(s, axis=-1, keepdims=True)
        p = jnp.exp(s - m)                            # fp32 softmax
        l = jnp.sum(p, axis=-1, keepdims=True)
        o = jnp.dot(p.astype(jnp.bfloat16), v, preferred_element_type=jnp.float32)
        # normalize the (Sq, dh) output with an EUP approx reciprocal instead of
        # dividing the (Sq, Sk) probability matrix.
        outs.append(o * pl.reciprocal(l, approx=True))
    attn = jnp.concatenate(outs, axis=-1)             # (Sq, D) fp32
    proj = (jnp.dot(attn.astype(jnp.bfloat16), wo_ref[...],
                    preferred_element_type=jnp.float32) + bo_ref[...])
    r = proj + r_ref[0][:Sq]                          # residual subset for cross
    nr_ref[0] = r                                     # residual_in_fp32
    y_ref[0] = _layernorm(r, g_ref[...], be_ref[...], eps)


def pallas_mha_out_ln(qkv3, res, wo, bo, gamma, beta, num_heads, q_rows=None):
    """qkv3: (B, S, 3D), res: (B, S, D) -> (y, new_residual), both (B, Sq, D).
    q_rows=1 => cross-attn with CLS query + residual subset."""
    B, S, D3 = qkv3.shape
    D = D3 // 3
    dh = D // num_heads
    Sq = S if q_rows is None else q_rows
    scale = 1.0 / math.sqrt(dh)
    return pl.pallas_call(
        functools.partial(_mha_out_ln_kernel, num_heads=num_heads, scale=scale,
                          q_rows=q_rows, eps=_LN_EPS),
        out_shape=(jax.ShapeDtypeStruct((B, Sq, D), jnp.float32),
                   jax.ShapeDtypeStruct((B, Sq, D), jnp.float32)),
        grid=(B,),
        in_specs=[
            pl.BlockSpec((1, S, D3), lambda i: (i, 0, 0)),
            pl.BlockSpec((1, S, D), lambda i: (i, 0, 0)),
            pl.BlockSpec((D, D), lambda i: (0, 0)),
            pl.BlockSpec((1, D), lambda i: (0, 0)),
            pl.BlockSpec((1, D), lambda i: (0, 0)),
            pl.BlockSpec((1, D), lambda i: (0, 0)),
        ],
        out_specs=(pl.BlockSpec((1, Sq, D), lambda i: (i, 0, 0)),
                   pl.BlockSpec((1, Sq, D), lambda i: (i, 0, 0))),
        compiler_params=pltpu.CompilerParams(dimension_semantics=("parallel",)),
    )(qkv3, res, wo.astype(jnp.bfloat16), bo.reshape(1, D),
      gamma.reshape(1, D), beta.reshape(1, D))


# ---------------------------------------------------------------------------
# Kernel 4: fused MLP fc1 + GELU + fc2 (hidden activations stay in VMEM)
# ---------------------------------------------------------------------------

def _mlp_kernel(x_ref, w1_ref, b1_ref, w2_ref, b2_ref, o_ref):
    h = (jnp.dot(x_ref[...].astype(jnp.bfloat16), w1_ref[...],
                 preferred_element_type=jnp.float32) + b1_ref[...])
    h = _gelu(h)                                      # fp32 elementwise
    o_ref[...] = (jnp.dot(h.astype(jnp.bfloat16), w2_ref[...],
                          preferred_element_type=jnp.float32) + b2_ref[...])


def pallas_mlp(x, w1, b1, w2, b2, tm=256):
    M, D = x.shape
    H = w1.shape[1]
    tm = _pick_tile(M, tm, 8)
    return pl.pallas_call(
        _mlp_kernel,
        out_shape=jax.ShapeDtypeStruct((M, D), jnp.float32),
        grid=(M // tm,),
        in_specs=[
            pl.BlockSpec((tm, D), lambda i: (i, 0)),
            pl.BlockSpec((D, H), lambda i: (0, 0)),
            pl.BlockSpec((1, H), lambda i: (0, 0)),
            pl.BlockSpec((H, D), lambda i: (0, 0)),
            pl.BlockSpec((1, D), lambda i: (0, 0)),
        ],
        out_specs=pl.BlockSpec((tm, D), lambda i: (i, 0)),
        compiler_params=pltpu.CompilerParams(dimension_semantics=("parallel",)),
    )(x, w1.astype(jnp.bfloat16), b1.reshape(1, H),
      w2.astype(jnp.bfloat16), b2.reshape(1, D))


# ---------------------------------------------------------------------------
# Block (flash-attn `Block`, prenorm=True, residual_in_fp32=True, dropouts=0).
# q_rows=None -> self-attn; q_rows=1 -> last (cross-attn) block, CLS query only
# (mixer_subset = slice(0, 1)); the combined [Wq | Wkv] weight is used with the
# same fused add+LN+matmul kernel — keeping only the CLS row of Q is
# numerically identical to projecting only the CLS token.
# ---------------------------------------------------------------------------

def run_block(hs, res, p, num_heads, q_rows=None):
    B, S, D = hs.shape
    M = B * S
    # add + LN1 + fused QKV projection (also emits new fp32 residual)
    qkv, res_new = pallas_add_ln_matmul(hs.reshape(M, D), res.reshape(M, D),
                                        p["ln1_g"], p["ln1_b"],
                                        p["wqkv"], p["bqkv"])
    # attention + out-proj + add + LN2 (per batch element)
    y2, res2 = pallas_mha_out_ln(qkv.reshape(B, S, 3 * D),
                                 res_new.reshape(B, S, D),
                                 p["wo"], p["bo"], p["ln2_g"], p["ln2_b"],
                                 num_heads, q_rows=q_rows)
    Sq = S if q_rows is None else q_rows
    # fused MLP
    out = pallas_mlp(y2.reshape(B * Sq, D), p["w1"], p["b1"], p["w2"], p["b2"])
    return out.reshape(B, Sq, D), res2


# ---------------------------------------------------------------------------
# Full model
# ---------------------------------------------------------------------------

def vit_forward(params, x, *, patch_size, num_heads):
    B, C, H, W = x.shape
    p = patch_size
    gh, gw = H // p, W // p
    npatch = gh * gw
    D = params["pos_embed"].shape[-1]

    # PatchEmbed: "b c (h p1) (w p2) -> b (h w) (c p1 p2)" then linear
    xp = (x.reshape(B, C, gh, p, gw, p)
            .transpose(0, 2, 4, 1, 3, 5)
            .reshape(B * npatch, C * p * p))
    tok = pallas_linear(xp, params["patch_w"], params["patch_b"]).reshape(B, npatch, D)

    # cls token + pos embed
    cls = jnp.broadcast_to(params["cls_token"], (B, 1, D)).astype(jnp.float32)
    hs = jnp.concatenate([cls, tok], axis=1) + params["pos_embed"]
    res = jnp.zeros_like(hs)        # first block: residual=None ≡ residual=0

    depth = len(params["blocks"])
    for i, blk in enumerate(params["blocks"]):
        q_rows = 1 if i == depth - 1 else None     # last block: CLS query only
        hs, res = run_block(hs, res, blk, num_heads, q_rows=q_rows)

    # final add + LayerNorm fused with the classification head (Sn == 1 → CLS)
    Bn, Sn, _ = hs.shape
    logits, _ = pallas_add_ln_matmul(hs.reshape(Bn * Sn, D),
                                     res.reshape(Bn * Sn, D),
                                     params["norm_g"], params["norm_b"],
                                     params["head_w"], params["head_b"])
    return logits


# ---------------------------------------------------------------------------
# Deterministic parameter init (synthetic; trunc-normal std=0.02 like timm init)
# ---------------------------------------------------------------------------

def init_params(key, *, in_chans, patch, embed_dim, depth, num_heads,
                mlp_ratio, num_classes, num_patches):
    D = embed_dim
    hidden = int(D * mlp_ratio)
    keys = iter(jax.random.split(key, 8 + 8 * depth))

    def tn(shape, std=0.02):
        return std * jax.random.truncated_normal(next(keys), -2.0, 2.0, shape, jnp.float32)

    params = {
        "patch_w": tn((in_chans * patch * patch, D)),
        "patch_b": jnp.zeros((D,), jnp.float32),
        "cls_token": 1e-6 * jax.random.normal(next(keys), (1, 1, D), jnp.float32),
        "pos_embed": tn((1, num_patches + 1, D)),
        "norm_g": jnp.ones((D,), jnp.float32),
        "norm_b": jnp.zeros((D,), jnp.float32),
        "head_w": tn((D, num_classes)),
        "head_b": jnp.zeros((num_classes,), jnp.float32),
        "blocks": [],
    }
    for _ in range(depth):
        # last block uses the same fused layout: columns [0,D)=Wq, [D,3D)=Wkv
        blk = {
            "ln1_g": jnp.ones((D,), jnp.float32), "ln1_b": jnp.zeros((D,), jnp.float32),
            "ln2_g": jnp.ones((D,), jnp.float32), "ln2_b": jnp.zeros((D,), jnp.float32),
            "wqkv": tn((D, 3 * D)), "bqkv": jnp.zeros((3 * D,), jnp.float32),
            "wo": tn((D, D)), "bo": jnp.zeros((D,), jnp.float32),
            "w1": tn((D, hidden)), "b1": jnp.zeros((hidden,), jnp.float32),
            "w2": tn((hidden, D)), "b2": jnp.zeros((D,), jnp.float32),
        }
        params["blocks"].append(blk)
    return params


# TODO(synk): dropout / stochastic-depth paths are identity at inference (all rates 0)
# and are therefore omitted rather than faked.

if __name__ == "__main__":
    # Small-shape config consistent with the module's forward:
    B, C, IMG, PATCH = 2, 4, 16, 8            # -> 4 patches + 1 CLS = seq 5
    D, DEPTH, HEADS = 32, 2, 4
    MLP_RATIO, NUM_CLASSES = 4.0, 8

    key = jax.random.PRNGKey(0)
    kx, kp = jax.random.split(key)
    x = jax.random.normal(kx, (B, C, IMG, IMG), jnp.float32)

    num_patches = (IMG // PATCH) ** 2
    params = init_params(kp, in_chans=C, patch=PATCH, embed_dim=D, depth=DEPTH,
                         num_heads=HEADS, mlp_ratio=MLP_RATIO,
                         num_classes=NUM_CLASSES, num_patches=num_patches)

    fwd = jax.jit(lambda p, xx: vit_forward(p, xx, patch_size=PATCH, num_heads=HEADS))
    out = fwd(params, x)
    out = jax.block_until_ready(out)
    assert out.shape == (B, NUM_CLASSES), out.shape
    assert bool(jnp.all(jnp.isfinite(out)))
    print("KERNEL_OK")
</pallas_src>

<mosaic_0001>
module attributes {stable_mosaic.version = 11 : i64} {
  func.func @_matmul_kernel(%arg0: i32, %arg1: i32, %arg2: i32, %arg3: memref<8x256xf32, #tpu.memory_space<vmem>>, %arg4: memref<256x32xbf16, #tpu.memory_space<vmem>>, %arg5: memref<1x32xf32, #tpu.memory_space<vmem>>, %arg6: memref<8x32xf32, #tpu.memory_space<vmem>>, %arg7: memref<8x32xf32, #tpu.memory_space<vmem>>) attributes {dimension_semantics = [#tpu.dimension_semantics<parallel>, #tpu.dimension_semantics<parallel>, #tpu.dimension_semantics<arbitrary>], iteration_bounds = array<i64: 1, 1, 1>, scalar_prefetch = 0 : i64, scratch_operands = 1 : i64, tpu.core_type = #tpu.core_type<tc>, window_params = [{transform_indices = @transform_0, window_bounds = array<i64: 8, 256>}, {transform_indices = @transform_1, window_bounds = array<i64: 256, 32>}, {transform_indices = @transform_2, window_bounds = array<i64: 1, 32>}, {transform_indices = @transform_3, window_bounds = array<i64: 8, 32>}]} {
    %c0_i32 = arith.constant 0 : i32
    %0 = arith.cmpi eq, %arg2, %c0_i32 : i32
    %1 = arith.extui %0 : i1 to i32
    %c0_i32_0 = arith.constant 0 : i32
    %2 = arith.cmpi ne, %1, %c0_i32_0 : i32
    scf.if %2 {
      %cst_10 = arith.constant 0.000000e+00 : f32
      %13 = vector.broadcast %cst_10 : f32 to vector<8x32xf32>
      %c0_11 = arith.constant 0 : index
      %c0_12 = arith.constant 0 : index
      %14 = vector.load %arg7[%c0_11, %c0_12] : memref<8x32xf32, #tpu.memory_space<vmem>>, vector<8x32xf32>
      tpu.vector_store %arg7[%c0_11, %c0_12], %13 {strides = array<i32>} : memref<8x32xf32, #tpu.memory_space<vmem>>, vector<8x32xf32>,
    } else {
    }
    %c0 = arith.constant 0 : index
    %c0_1 = arith.constant 0 : index
    %3 = vector.load %arg7[%c0, %c0_1] : memref<8x32xf32, #tpu.memory_space<vmem>>, vector<8x32xf32>
    %c0_2 = arith.constant 0 : index
    %c0_3 = arith.constant 0 : index
    %4 = vector.load %arg3[%c0_2, %c0_3] : memref<8x256xf32, #tpu.memory_space<vmem>>, vector<8x256xf32>
    %5 = arith.truncf %4 : vector<8x256xf32> to vector<8x256xbf16>
    %c0_4 = arith.constant 0 : index
    %c0_5 = arith.constant 0 : index
    %6 = vector.load %arg4[%c0_4, %c0_5] : memref<256x32xbf16, #tpu.memory_space<vmem>>, vector<256x32xbf16>
    %cst = arith.constant dense<0.000000e+00> : vector<8x32xf32>
    %7 = tpu.matmul %5, %6, %cst {dimension_numbers = #tpu.dot_dimension_numbers<[1], [0], [0], [1], [0, 0, 1, 1], [], []>} : vector<8x256xbf16>, vector<256x32xbf16>, vector<8x32xf32> -> vector<8x32xf32>
    %8 = arith.addf %3, %7 : vector<8x32xf32>
    %c0_6 = arith.constant 0 : index
    %c0_7 = arith.constant 0 : index
    %9 = vector.load %arg7[%c0_6, %c0_7] : memref<8x32xf32, #tpu.memory_space<vmem>>, vector<8x32xf32>
    tpu.vector_store %arg7[%c0_6, %c0_7], %8 {strides = array<i32>} : memref<8x32xf32, #tpu.memory_space<vmem>>, vector<8x32xf32>,
    %c0_i32_8 = arith.constant 0 : i32
    %10 = arith.cmpi eq, %arg2, %c0_i32_8 : i32
    %11 = arith.extui %10 : i1 to i32
    %c0_i32_9 = arith.constant 0 : i32
    %12 = arith.cmpi ne, %11, %c0_i32_9 : i32
    scf.if %12 {
      %c0_10 = arith.constant 0 : index
      %c0_11 = arith.constant 0 : index
      %13 = vector.load %arg7[%c0_10, %c0_11] : memref<8x32xf32, #tpu.memory_space<vmem>>, vector<8x32xf32>
      %c0_12 = arith.constant 0 : index
      %c0_13 = arith.constant 0 : index
      %14 = vector.load %arg5[%c0_12, %c0_13] : memref<1x32xf32, #tpu.memory_space<vmem>>, vector<1x32xf32>
      %15 = vector.broadcast %14 : vector<1x32xf32> to vector<8x32xf32>
      %16 = arith.addf %13, %15 : vector<8x32xf32>
      %c0_14 = arith.constant 0 : index
      %c0_15 = arith.constant 0 : index
      %17 = vector.load %arg6[%c0_14, %c0_15] : memref<8x32xf32, #tpu.memory_space<vmem>>, vector<8x32xf32>
      tpu.vector_store %arg6[%c0_14, %c0_15], %16 {strides = array<i32>} : memref<8x32xf32, #tpu.memory_space<vmem>>, vector<8x32xf32>,
    } else {
    }
    return
  }
  func.func @transform_0(%arg0: i32, %arg1: i32, %arg2: i32) -> (i32, i32) {
    %c0_i32 = arith.constant 0 : i32
    return %arg0, %arg2 : i32, i32
  }
  func.func @transform_1(%arg0: i32, %arg1: i32, %arg2: i32) -> (i32, i32) {
    %c0_i32 = arith.constant 0 : i32
    return %arg2, %arg1 : i32, i32
  }
  func.func @transform_2(%arg0: i32, %arg1: i32, %arg2: i32) -> (i32, i32) {
    %c0_i32 = arith.constant 0 : i32
    %c0_i32_0 = arith.constant 0 : i32
    return %c0_i32, %arg1 : i32, i32
  }
  func.func @transform_3(%arg0: i32, %arg1: i32, %arg2: i32) -> (i32, i32) {
    %c0_i32 = arith.constant 0 : i32
    return %arg0, %arg1 : i32, i32
  }
}

module attributes {stable_mosaic.version = 11 : i64} {
  func.func @_add_ln_matmul_kernel(%arg0: i32, %arg1: memref<10x32xf32, #tpu.memory_space<vmem>>, %arg2: memref<10x32xf32, #tpu.memory_space<vmem>>, %arg3: memref<1x32xf32, #tpu.memory_space<vmem>>, %arg4: memref<1x32xf32, #tpu.memory_space<vmem>>, %arg5: memref<32x96xbf16, #tpu.memory_space<vmem>>, %arg6: memref<1x96xf32, #tpu.memory_space<vmem>>, %arg7: memref<10x96xf32, #tpu.memory_space<vmem>>, %arg8: memref<10x32xf32, #tpu.memory_space<vmem>>) attributes {dimension_semantics = [#tpu.dimension_semantics<parallel>], iteration_bounds = array<i64: 1>, scalar_prefetch = 0 : i64, scratch_operands = 0 : i64, tpu.core_type = #tpu.core_type<tc>, window_params = [{transform_indices = @transform_0, window_bounds = array<i64: 10, 32>}, {transform_indices = @transform_1, window_bounds = array<i64: 10, 32>}, {pipeline_mode = #tpu.pipeline_mode<synchronous>, transform_indices = @transform_2, window_bounds = array<i64: 1, 32>}, {pipeline_mode = #tpu.pipeline_mode<synchronous>, transform_indices = @transform_3, window_bounds = array<i64: 1, 32>}, {pipeline_mode = #tpu.pipeline_mode<synchronous>, transform_indices = @transform_4, window_bounds = array<i64: 32, 96>}, {pipeline_mode = #tpu.pipeline_mode<synchronous>, transform_indices = @transform_5, window_bounds = array<i64: 1, 96>}, {transform_indices = @transform_6, window_bounds = array<i64: 10, 96>}, {transform_indices = @transform_7, window_bounds = array<i64: 10, 32>}]} {
    %c0 = arith.constant 0 : index
    %c0_0 = arith.constant 0 : index
    %0 = vector.load %arg1[%c0, %c0_0] : memref<10x32xf32, #tpu.memory_space<vmem>>, vector<10x32xf32>
    %c0_1 = arith.constant 0 : index
    %c0_2 = arith.constant 0 : index
    %1 = vector.load %arg2[%c0_1, %c0_2] : memref<10x32xf32, #tpu.memory_space<vmem>>, vector<10x32xf32>
    %2 = arith.addf %0, %1 : vector<10x32xf32>
    %c0_3 = arith.constant 0 : index
    %c0_4 = arith.constant 0 : index
    %3 = vector.load %arg8[%c0_3, %c0_4] : memref<10x32xf32, #tpu.memory_space<vmem>>, vector<10x32xf32>
    tpu.vector_store %arg8[%c0_3, %c0_4], %2 {strides = array<i32>} : memref<10x32xf32, #tpu.memory_space<vmem>>, vector<10x32xf32>,
    %c0_5 = arith.constant 0 : index
    %c0_6 = arith.constant 0 : index
    %4 = vector.load %arg3[%c0_5, %c0_6] : memref<1x32xf32, #tpu.memory_space<vmem>>, vector<1x32xf32>
    %c0_7 = arith.constant 0 : index
    %c0_8 = arith.constant 0 : index
    %5 = vector.load %arg4[%c0_7, %c0_8] : memref<1x32xf32, #tpu.memory_space<vmem>>, vector<1x32xf32>
    %cst = arith.constant dense<0.000000e+00> : vector<10xf32>
    %6 = vector.multi_reduction <add>, %2, %cst [1] : vector<10x32xf32> to vector<10xf32>
    %7 = vector.shape_cast %6 : vector<10xf32> to vector<10x1xf32>
    %cst_9 = arith.constant 3.200000e+01 : f32
    %8 = vector.broadcast %cst_9 : f32 to vector<10x1xf32>
    %9 = arith.divf %7, %8 : vector<10x1xf32>
    %10 = vector.broadcast %9 : vector<10x1xf32> to vector<10x32xf32>
    %11 = arith.subf %2, %10 : vector<10x32xf32>
    %12 = arith.mulf %11, %11 : vector<10x32xf32>
    %cst_10 = arith.constant dense<0.000000e+00> : vector<10xf32>
    %13 = vector.multi_reduction <add>, %12, %cst_10 [1] : vector<10x32xf32> to vector<10xf32>
    %14 = vector.shape_cast %13 : vector<10xf32> to vector<10x1xf32>
    %cst_11 = arith.constant 3.200000e+01 : f32
    %15 = vector.broadcast %cst_11 : f32 to vector<10x1xf32>
    %16 = arith.divf %14, %15 : vector<10x1xf32>
    %17 = vector.broadcast %9 : vector<10x1xf32> to vector<10x32xf32>
    %18 = arith.subf %2, %17 : vector<10x32xf32>
    %cst_12 = arith.constant 9.99999997E-7 : f32
    %19 = vector.broadcast %cst_12 : f32 to vector<10x1xf32>
    %20 = arith.addf %16, %19 : vector<10x1xf32>
    %21 = math.rsqrt %20 : vector<10x1xf32>
    %22 = vector.broadcast %21 : vector<10x1xf32> to vector<10x32xf32>
    %23 = arith.mulf %18, %22 : vector<10x32xf32>
    %24 = vector.broadcast %4 : vector<1x32xf32> to vector<10x32xf32>
    %25 = arith.mulf %23, %24 : vector<10x32xf32>
    %26 = vector.broadcast %5 : vector<1x32xf32> to vector<10x32xf32>
    %27 = arith.addf %25, %26 : vector<10x32xf32>
    %28 = arith.truncf %27 : vector<10x32xf32> to vector<10x32xbf16>
    %c0_13 = arith.constant 0 : index
    %c0_14 = arith.constant 0 : index
    %29 = vector.load %arg5[%c0_13, %c0_14] : memref<32x96xbf16, #tpu.memory_space<vmem>>, vector<32x96xbf16>
    %cst_15 = arith.constant dense<0.000000e+00> : vector<10x96xf32>
    %30 = tpu.matmul %28, %29, %cst_15 {dimension_numbers = #tpu.dot_dimension_numbers<[1], [0], [0], [1], [0, 0, 1, 1], [], []>} : vector<10x32xbf16>, vector<32x96xbf16>, vector<10x96xf32> -> vector<10x96xf32>
    %c0_16 = arith.constant 0 : index
    %c0_17 = arith.constant 0 : index
    %31 = vector.load %arg6[%c0_16, %c0_17] : memref<1x96xf32, #tpu.memory_space<vmem>>, vector<1x96xf32>
    %32 = vector.broadcast %31 : vector<1x96xf32> to vector<10x96xf32>
    %33 = arith.addf %30, %32 : vector<10x96xf32>
    %c0_18 = arith.constant 0 : index
    %c0_19 = arith.constant 0 : index
    %34 = vector.load %arg7[%c0_18, %c0_19] : memref<10x96xf32, #tpu.memory_space<vmem>>, vector<10x96xf32>
    tpu.vector_store %arg7[%c0_18, %c0_19], %33 {strides = array<i32>} : memref<10x96xf32, #tpu.memory_space<vmem>>, vector<10x96xf32>,
    return
  }
  func.func @transform_0(%arg0: i32) -> (i32, i32) {
    %c0_i32 = arith.constant 0 : i32
    %c0_i32_0 = arith.constant 0 : i32
    return %arg0, %c0_i32 : i32, i32
  }
  func.func @transform_1(%arg0: i32) -> (i32, i32) {
    %c0_i32 = arith.constant 0 : i32
    %c0_i32_0 = arith.constant 0 : i32
    return %arg0, %c0_i32 : i32, i32
  }
  func.func @transform_2(%arg0: i32) -> (i32, i32) {
    %c0_i32 = arith.constant 0 : i32
    %c0_i32_0 = arith.constant 0 : i32
    %c0_i32_1 = arith.constant 0 : i32
    return %c0_i32, %c0_i32_0 : i32, i32
  }
  func.func @transform_3(%arg0: i32) -> (i32, i32) {
    %c0_i32 = arith.constant 0 : i32
    %c0_i32_0 = arith.constant 0 : i32
    %c0_i32_1 = arith.constant 0 : i32
    return %c0_i32, %c0_i32_0 : i32, i32
  }
  func.func @transform_4(%arg0: i32) -> (i32, i32) {
    %c0_i32 = arith.constant 0 : i32
    %c0_i32_0 = arith.constant 0 : i32
    %c0_i32_1 = arith.constant 0 : i32
    return %c0_i32, %c0_i32_0 : i32, i32
  }
  func.func @transform_5(%arg0: i32) -> (i32, i32) {
    %c0_i32 = arith.constant 0 : i32
    %c0_i32_0 = arith.constant 0 : i32
    %c0_i32_1 = arith.constant 0 : i32
    return %c0_i32, %c0_i32_0 : i32, i32
  }
  func.func @transform_6(%arg0: i32) -> (i32, i32) {
    %c0_i32 = arith.constant 0 : i32
    %c0_i32_0 = arith.constant 0 : i32
    return %arg0, %c0_i32 : i32, i32
  }
  func.func @transform_7(%arg0: i32) -> (i32, i32) {
    %c0_i32 = arith.constant 0 : i32
    %c0_i32_0 = arith.constant 0 : i32
    return %arg0, %c0_i32 : i32, i32
  }
}

module attributes {stable_mosaic.version = 11 : i64} {
  func.func @_mha_out_ln_kernel(%arg0: i32, %arg1: memref<1x5x96xf32, #tpu.memory_space<vmem>>, %arg2: memref<1x5x32xf32, #tpu.memory_space<vmem>>, %arg3: memref<32x32xbf16, #tpu.memory_space<vmem>>, %arg4: memref<1x32xf32, #tpu.memory_space<vmem>>, %arg5: memref<1x32xf32, #tpu.memory_space<vmem>>, %arg6: memref<1x32xf32, #tpu.memory_space<vmem>>, %arg7: memref<1x5x32xf32, #tpu.memory_space<vmem>>, %arg8: memref<1x5x32xf32, #tpu.memory_space<vmem>>) attributes {dimension_semantics = [#tpu.dimension_semantics<parallel>], iteration_bounds = array<i64: 2>, scalar_prefetch = 0 : i64, scratch_operands = 0 : i64, tpu.core_type = #tpu.core_type<tc>, window_params = [{transform_indices = @transform_0, window_bounds = array<i64: 1, 5, 96>}, {transform_indices = @transform_1, window_bounds = array<i64: 1, 5, 32>}, {pipeline_mode = #tpu.pipeline_mode<synchronous>, transform_indices = @transform_2, window_bounds = array<i64: 32, 32>}, {pipeline_mode = #tpu.pipeline_mode<synchronous>, transform_indices = @transform_3, window_bounds = array<i64: 1, 32>}, {pipeline_mode = #tpu.pipeline_mode<synchronous>, transform_indices = @transform_4, window_bounds = array<i64: 1, 32>}, {pipeline_mode = #tpu.pipeline_mode<synchronous>, transform_indices = @transform_5, window_bounds = array<i64: 1, 32>}, {transform_indices = @transform_6, window_bounds = array<i64: 1, 5, 32>}, {transform_indices = @transform_7, window_bounds = array<i64: 1, 5, 32>}]} {
    %c0 = arith.constant 0 : index
    %c0_0 = arith.constant 0 : index
    %c0_1 = arith.constant 0 : index
    %0 = vector.load %arg1[%c0, %c0_0, %c0_1] : memref<1x5x96xf32, #tpu.memory_space<vmem>>, vector<1x5x96xf32>
    %1 = vector.shape_cast %0 : vector<1x5x96xf32> to vector<5x96xf32>
    %2 = vector.extract_strided_slice %1 {offsets = [0, 0], sizes = [5, 8], strides = [1, 1]} : vector<5x96xf32> to vector<5x8xf32>
    %cst = arith.constant 0.353553385 : f32
    %3 = vector.broadcast %cst : f32 to vector<5x8xf32>
    %4 = arith.mulf %2, %3 : vector<5x8xf32>
    %5 = arith.truncf %4 : vector<5x8xf32> to vector<5x8xbf16>
    %6 = vector.extract_strided_slice %1 {offsets = [0, 32], sizes = [5, 8], strides = [1, 1]} : vector<5x96xf32> to vector<5x8xf32>
    %7 = arith.truncf %6 : vector<5x8xf32> to vector<5x8xbf16>
    %8 = vector.extract_strided_slice %1 {offsets = [0, 64], sizes = [5, 8], strides = [1, 1]} : vector<5x96xf32> to vector<5x8xf32>
    %9 = arith.truncf %8 : vector<5x8xf32> to vector<5x8xbf16>
    %cst_2 = arith.constant dense<0.000000e+00> : vector<5x5xf32>
    %10 = tpu.matmul %5, %7, %cst_2 {dimension_numbers = #tpu.dot_dimension_numbers<[1], [1], [0], [0], [0, 0, 1, 0], [], []>} : vector<5x8xbf16>, vector<5x8xbf16>, vector<5x5xf32> -> vector<5x5xf32>
    %cst_3 = arith.constant dense<0xFF800000> : vector<5xf32>
    %11 = vector.multi_reduction <maximumf>, %10, %cst_3 [1] : vector<5x5xf32> to vector<5xf32>
    %12 = vector.shape_cast %11 : vector<5xf32> to vector<5x1xf32>
    %13 = vector.broadcast %12 : vector<5x1xf32> to vector<5x5xf32>
    %14 = arith.subf %10, %13 : vector<5x5xf32>
    %15 = math.exp %14 : vector<5x5xf32>
    %cst_4 = arith.constant dense<0.000000e+00> : vector<5xf32>
    %16 = vector.multi_reduction <add>, %15, %cst_4 [1] : vector<5x5xf32> to vector<5xf32>
    %17 = vector.shape_cast %16 : vector<5xf32> to vector<5x1xf32>
    %18 = arith.truncf %15 : vector<5x5xf32> to vector<5x5xbf16>
    %cst_5 = arith.constant dense<0.000000e+00> : vector<5x8xf32>
    %19 = tpu.matmul %18, %9, %cst_5 {dimension_numbers = #tpu.dot_dimension_numbers<[1], [0], [0], [1], [0, 0, 1, 1], [], []>} : vector<5x5xbf16>, vector<5x8xbf16>, vector<5x8xf32> -> vector<5x8xf32>
    %20 = tpu.reciprocal %17 {approx = true} : vector<5x1xf32> -> vector<5x1xf32>
    %21 = vector.broadcast %20 : vector<5x1xf32> to vector<5x8xf32>
    %22 = arith.mulf %19, %21 : vector<5x8xf32>
    %23 = vector.extract_strided_slice %1 {offsets = [0, 8], sizes = [5, 8], strides = [1, 1]} : vector<5x96xf32> to vector<5x8xf32>
    %cst_6 = arith.constant 0.353553385 : f32
    %24 = vector.broadcast %cst_6 : f32 to vector<5x8xf32>
    %25 = arith.mulf %23, %24 : vector<5x8xf32>
    %26 = arith.truncf %25 : vector<5x8xf32> to vector<5x8xbf16>
    %27 = vector.extract_strided_slice %1 {offsets = [0, 40], sizes = [5, 8], strides = [1, 1]} : vector<5x96xf32> to vector<5x8xf32>
    %28 = arith.truncf %27 : vector<5x8xf32> to vector<5x8xbf16>
    %29 = vector.extract_strided_slice %1 {offsets = [0, 72], sizes = [5, 8], strides = [1, 1]} : vector<5x96xf32> to vector<5x8xf32>
    %30 = arith.truncf %29 : vector<5x8xf32> to vector<5x8xbf16>
    %cst_7 = arith.constant dense<0.000000e+00> : vector<5x5xf32>
    %31 = tpu.matmul %26, %28, %cst_7 {dimension_numbers = #tpu.dot_dimension_numbers<[1], [1], [0], [0], [0, 0, 1, 0], [], []>} : vector<5x8xbf16>, vector<5x8xbf16>, vector<5x5xf32> -> vector<5x5xf32>
    %cst_8 = arith.constant dense<0xFF800000> : vector<5xf32>
    %32 = vector.multi_reduction <maximumf>, %31, %cst_8 [1] : vector<5x5xf32> to vector<5xf32>
    %33 = vector.shape_cast %32 : vector<5xf32> to vector<5x1xf32>
    %34 = vector.broadcast %33 : vector<5x1xf32> to vector<5x5xf32>
    %35 = arith.subf %31, %34 : vector<5x5xf32>
    %36 = math.exp %35 : vector<5x5xf32>
    %cst_9 = arith.constant dense<0.000000e+00> : vector<5xf32>
    %37 = vector.multi_reduction <add>, %36, %cst_9 [1] : vector<5x5xf32> to vector<5xf32>
    %38 = vector.shape_cast %37 : vector<5xf32> to vector<5x1xf32>
    %39 = arith.truncf %36 : vector<5x5xf32> to vector<5x5xbf16>
    %cst_10 = arith.constant dense<0.000000e+00> : vector<5x8xf32>
    %40 = tpu.matmul %39, %30, %cst_10 {dimension_numbers = #tpu.dot_dimension_numbers<[1], [0], [0], [1], [0, 0, 1, 1], [], []>} : vector<5x5xbf16>, vector<5x8xbf16>, vector<5x8xf32> -> vector<5x8xf32>
    %41 = tpu.reciprocal %38 {approx = true} : vector<5x1xf32> -> vector<5x1xf32>
    %42 = vector.broadcast %41 : vector<5x1xf32> to vector<5x8xf32>
    %43 = arith.mulf %40, %42 : vector<5x8xf32>
    %44 = vector.extract_strided_slice %1 {offsets = [0, 16], sizes = [5, 8], strides = [1, 1]} : vector<5x96xf32> to vector<5x8xf32>
    %cst_11 = arith.constant 0.353553385 : f32
    %45 = vector.broadcast %cst_11 : f32 to vector<5x8xf32>
    %46 = arith.mulf %44, %45 : vector<5x8xf32>
    %47 = arith.truncf %46 : vector<5x8xf32> to vector<5x8xbf16>
    %48 = vector.extract_strided_slice %1 {offsets = [0, 48], sizes = [5, 8], strides = [1, 1]} : vector<5x96xf32> to vector<5x8xf32>
    %49 = arith.truncf %48 : vector<5x8xf32> to vector<5x8xbf16>
    %50 = vector.extract_strided_slice %1 {offsets = [0, 80], sizes = [5, 8], strides = [1, 1]} : vector<5x96xf32> to vector<5x8xf32>
    %51 = arith.truncf %50 : vector<5x8xf32> to vector<5x8xbf16>
    %cst_12 = arith.constant dense<0.000000e+00> : vector<5x5xf32>
    %52 = tpu.matmul %47, %49, %cst_12 {dimension_numbers = #tpu.dot_dimension_numbers<[1], [1], [0], [0], [0, 0, 1, 0], [], []>} : vector<5x8xbf16>, vector<5x8xbf16>, vector<5x5xf32> -> vector<5x5xf32>
    %cst_13 = arith.constant dense<0xFF800000> : vector<5xf32>
    %53 = vector.multi_reduction <maximumf>, %52, %cst_13 [1] : vector<5x5xf32> to vector<5xf32>
    %54 = vector.shape_cast %53 : vector<5xf32> to vector<5x1xf32>
    %55 = vector.broadcast %54 : vector<5x1xf32> to vector<5x5xf32>
    %56 = arith.subf %52, %55 : vector<5x5xf32>
    %57 = math.exp %56 : vector<5x5xf32>
    %cst_14 = arith.constant dense<0.000000e+00> : vector<5xf32>
    %58 = vector.multi_reduction <add>, %57, %cst_14 [1] : vector<5x5xf32> to vector<5xf32>
    %59 = vector.shape_cast %58 : vector<5xf32> to vector<5x1xf32>
    %60 = arith.truncf %57 : vector<5x5xf32> to vector<5x5xbf16>
    %cst_15 = arith.constant dense<0.000000e+00> : vector<5x8xf32>
    %61 = tpu.matmul %60, %51, %cst_15 {dimension_numbers = #tpu.dot_dimension_numbers<[1], [0], [0], [1], [0, 0, 1, 1], [], []>} : vector<5x5xbf16>, vector<5x8xbf16>, vector<5x8xf32> -> vector<5x8xf32>
    %62 = tpu.reciprocal %59 {approx = true} : vector<5x1xf32> -> vector<5x1xf32>
    %63 = vector.broadcast %62 : vector<5x1xf32> to vector<5x8xf32>
    %64 = arith.mulf %61, %63 : vector<5x8xf32>
    %65 = vector.extract_strided_slice %1 {offsets = [0, 24], sizes = [5, 8], strides = [1, 1]} : vector<5x96xf32> to vector<5x8xf32>
    %cst_16 = arith.constant 0.353553385 : f32
    %66 = vector.broadcast %cst_16 : f32 to vector<5x8xf32>
    %67 = arith.mulf %65, %66 : vector<5x8xf32>
    %68 = arith.truncf %67 : vector<5x8xf32> to vector<5x8xbf16>
    %69 = vector.extract_strided_slice %1 {offsets = [0, 56], sizes = [5, 8], strides = [1, 1]} : vector<5x96xf32> to vector<5x8xf32>
    %70 = arith.truncf %69 : vector<5x8xf32> to vector<5x8xbf16>
    %71 = vector.extract_strided_slice %1 {offsets = [0, 88], sizes = [5, 8], strides = [1, 1]} : vector<5x96xf32> to vector<5x8xf32>
    %72 = arith.truncf %71 : vector<5x8xf32> to vector<5x8xbf16>
    %cst_17 = arith.constant dense<0.000000e+00> : vector<5x5xf32>
    %73 = tpu.matmul %68, %70, %cst_17 {dimension_numbers = #tpu.dot_dimension_numbers<[1], [1], [0], [0], [0, 0, 1, 0], [], []>} : vector<5x8xbf16>, vector<5x8xbf16>, vector<5x5xf32> -> vector<5x5xf32>
    %cst_18 = arith.constant dense<0xFF800000> : vector<5xf32>
    %74 = vector.multi_reduction <maximumf>, %73, %cst_18 [1] : vector<5x5xf32> to vector<5xf32>
    %75 = vector.shape_cast %74 : vector<5xf32> to vector<5x1xf32>
    %76 = vector.broadcast %75 : vector<5x1xf32> to vector<5x5xf32>
    %77 = arith.subf %73, %76 : vector<5x5xf32>
    %78 = math.exp %77 : vector<5x5xf32>
    %cst_19 = arith.constant dense<0.000000e+00> : vector<5xf32>
    %79 = vector.multi_reduction <add>, %78, %cst_19 [1] : vector<5x5xf32> to vector<5xf32>
    %80 = vector.shape_cast %79 : vector<5xf32> to vector<5x1xf32>
    %81 = arith.truncf %78 : vector<5x5xf32> to vector<5x5xbf16>
    %cst_20 = arith.constant dense<0.000000e+00> : vector<5x8xf32>
    %82 = tpu.matmul %81, %72, %cst_20 {dimension_numbers = #tpu.dot_dimension_numbers<[1], [0], [0], [1], [0, 0, 1, 1], [], []>} : vector<5x5xbf16>, vector<5x8xbf16>, vector<5x8xf32> -> vector<5x8xf32>
    %83 = tpu.reciprocal %80 {approx = true} : vector<5x1xf32> -> vector<5x1xf32>
    %84 = vector.broadcast %83 : vector<5x1xf32> to vector<5x8xf32>
    %85 = arith.mulf %82, %84 : vector<5x8xf32>
    %86 = tpu.concatenate %22, %43, %64, %85 in 1 : vector<5x8xf32>, vector<5x8xf32>, vector<5x8xf32>, vector<5x8xf32> -> vector<5x32xf32>
    %87 = arith.truncf %86 : vector<5x32xf32> to vector<5x32xbf16>
    %c0_21 = arith.constant 0 : index
    %c0_22 = arith.constant 0 : index
    %88 = vector.load %arg3[%c0_21, %c0_22] : memref<32x32xbf16, #tpu.memory_space<vmem>>, vector<32x32xbf16>
    %cst_23 = arith.constant dense<0.000000e+00> : vector<5x32xf32>
    %89 = tpu.matmul %87, %88, %cst_23 {dimension_numbers = #tpu.dot_dimension_numbers<[1], [0], [0], [1], [0, 0, 1, 1], [], []>} : vector<5x32xbf16>, vector<32x32xbf16>, vector<5x32xf32> -> vector<5x32xf32>
    %c0_24 = arith.constant 0 : index
    %c0_25 = arith.constant 0 : index
    %90 = vector.load %arg4[%c0_24, %c0_25] : memref<1x32xf32, #tpu.memory_space<vmem>>, vector<1x32xf32>
    %91 = vector.broadcast %90 : vector<1x32xf32> to vector<5x32xf32>
    %92 = arith.addf %89, %91 : vector<5x32xf32>
    %c0_26 = arith.constant 0 : index
    %c0_27 = arith.constant 0 : index
    %c0_28 = arith.constant 0 : index
    %93 = vector.load %arg2[%c0_26, %c0_27, %c0_28] : memref<1x5x32xf32, #tpu.memory_space<vmem>>, vector<1x5x32xf32>
    %94 = vector.shape_cast %93 : vector<1x5x32xf32> to vector<5x32xf32>
    %95 = arith.addf %92, %94 : vector<5x32xf32>
    %c0_29 = arith.constant 0 : index
    %c0_30 = arith.constant 0 : index
    %c0_31 = arith.constant 0 : index
    %96 = vector.load %arg8[%c0_29, %c0_30, %c0_31] : memref<1x5x32xf32, #tpu.memory_space<vmem>>, vector<1x5x32xf32>
    %97 = vector.shape_cast %96 : vector<1x5x32xf32> to vector<5x32xf32>
    %98 = vector.shape_cast %95 : vector<5x32xf32> to vector<1x5x32xf32>
    tpu.vector_store %arg8[%c0_29, %c0_30, %c0_31], %98 {strides = array<i32>} : memref<1x5x32xf32, #tpu.memory_space<vmem>>, vector<1x5x32xf32>,
    %c0_32 = arith.constant 0 : index
    %c0_33 = arith.constant 0 : index
    %99 = vector.load %arg5[%c0_32, %c0_33] : memref<1x32xf32, #tpu.memory_space<vmem>>, vector<1x32xf32>
    %c0_34 = arith.constant 0 : index
    %c0_35 = arith.constant 0 : index
    %100 = vector.load %arg6[%c0_34, %c0_35] : memref<1x32xf32, #tpu.memory_space<vmem>>, vector<1x32xf32>
    %cst_36 = arith.constant dense<0.000000e+00> : vector<5xf32>
    %101 = vector.multi_reduction <add>, %95, %cst_36 [1] : vector<5x32xf32> to vector<5xf32>
    %102 = vector.shape_cast %101 : vector<5xf32> to vector<5x1xf32>
    %cst_37 = arith.constant 3.200000e+01 : f32
    %103 = vector.broadcast %cst_37 : f32 to vector<5x1xf32>
    %104 = arith.divf %102, %103 : vector<5x1xf32>
    %105 = vector.broadcast %104 : vector<5x1xf32> to vector<5x32xf32>
    %106 = arith.subf %95, %105 : vector<5x32xf32>
    %107 = arith.mulf %106, %106 : vector<5x32xf32>
    %cst_38 = arith.constant dense<0.000000e+00> : vector<5xf32>
    %108 = vector.multi_reduction <add>, %107, %cst_38 [1] : vector<5x32xf32> to vector<5xf32>
    %109 = vector.shape_cast %108 : vector<5xf32> to vector<5x1xf32>
    %cst_39 = arith.constant 3.200000e+01 : f32
    %110 = vector.broadcast %cst_39 : f32 to vector<5x1xf32>
    %111 = arith.divf %109, %110 : vector<5x1xf32>
    %112 = vector.broadcast %104 : vector<5x1xf32> to vector<5x32xf32>
    %113 = arith.subf %95, %112 : vector<5x32xf32>
    %cst_40 = arith.constant 9.99999997E-7 : f32
    %114 = vector.broadcast %cst_40 : f32 to vector<5x1xf32>
    %115 = arith.addf %111, %114 : vector<5x1xf32>
    %116 = math.rsqrt %115 : vector<5x1xf32>
    %117 = vector.broadcast %116 : vector<5x1xf32> to vector<5x32xf32>
    %118 = arith.mulf %113, %117 : vector<5x32xf32>
    %119 = vector.broadcast %99 : vector<1x32xf32> to vector<5x32xf32>
    %120 = arith.mulf %118, %119 : vector<5x32xf32>
    %121 = vector.broadcast %100 : vector<1x32xf32> to vector<5x32xf32>
    %122 = arith.addf %120, %121 : vector<5x32xf32>
    %c0_41 = arith.constant 0 : index
    %c0_42 = arith.constant 0 : index
    %c0_43 = arith.constant 0 : index
    %123 = vector.load %arg7[%c0_41, %c0_42, %c0_43] : memref<1x5x32xf32, #tpu.memory_space<vmem>>, vector<1x5x32xf32>
    %124 = vector.shape_cast %123 : vector<1x5x32xf32> to vector<5x32xf32>
    %125 = vector.shape_cast %122 : vector<5x32xf32> to vector<1x5x32xf32>
    tpu.vector_store %arg7[%c0_41, %c0_42, %c0_43], %125 {strides = array<i32>} : memref<1x5x32xf32, #tpu.memory_space<vmem>>, vector<1x5x32xf32>,
    return
  }
  func.func @transform_0(%arg0: i32) -> (i32, i32, i32) {
    %c0_i32 = arith.constant 0 : i32
    %c0_i32_0 = arith.constant 0 : i32
    %c0_i32_1 = arith.constant 0 : i32
    return %arg0, %c0_i32, %c0_i32_0 : i32, i32, i32
  }
  func.func @transform_1(%arg0: i32) -> (i32, i32, i32) {
    %c0_i32 = arith.constant 0 : i32
    %c0_i32_0 = arith.constant 0 : i32
    %c0_i32_1 = arith.constant 0 : i32
    return %arg0, %c0_i32, %c0_i32_0 : i32, i32, i32
  }
  func.func @transform_2(%arg0: i32) -> (i32, i32) {
    %c0_i32 = arith.constant 0 : i32
    %c0_i32_0 = arith.constant 0 : i32
    %c0_i32_1 = arith.constant 0 : i32
    return %c0_i32, %c0_i32_0 : i32, i32
  }
  func.func @transform_3(%arg0: i32) -> (i32, i32) {
    %c0_i32 = arith.constant 0 : i32
    %c0_i32_0 = arith.constant 0 : i32
    %c0_i32_1 = arith.constant 0 : i32
    return %c0_i32, %c0_i32_0 : i32, i32
  }
  func.func @transform_4(%arg0: i32) -> (i32, i32) {
    %c0_i32 = arith.constant 0 : i32
    %c0_i32_0 = arith.constant 0 : i32
    %c0_i32_1 = arith.constant 0 : i32
    return %c0_i32, %c0_i32_0 : i32, i32
  }
  func.func @transform_5(%arg0: i32) -> (i32, i32) {
    %c0_i32 = arith.constant 0 : i32
    %c0_i32_0 = arith.constant 0 : i32
    %c0_i32_1 = arith.constant 0 : i32
    return %c0_i32, %c0_i32_0 : i32, i32
  }
  func.func @transform_6(%arg0: i32) -> (i32, i32, i32) {
    %c0_i32 = arith.constant 0 : i32
    %c0_i32_0 = arith.constant 0 : i32
    %c0_i32_1 = arith.constant 0 : i32
    return %arg0, %c0_i32, %c0_i32_0 : i32, i32, i32
  }
  func.func @transform_7(%arg0: i32) -> (i32, i32, i32) {
    %c0_i32 = arith.constant 0 : i32
    %c0_i32_0 = arith.constant 0 : i32
    %c0_i32_1 = arith.constant 0 : i32
    return %arg0, %c0_i32, %c0_i32_0 : i32, i32, i32
  }
}

module attributes {stable_mosaic.version = 11 : i64} {
  func.func @_mlp_kernel(%arg0: i32, %arg1: memref<10x32xf32, #tpu.memory_space<vmem>>, %arg2: memref<32x128xbf16, #tpu.memory_space<vmem>>, %arg3: memref<1x128xf32, #tpu.memory_space<vmem>>, %arg4: memref<128x32xbf16, #tpu.memory_space<vmem>>, %arg5: memref<1x32xf32, #tpu.memory_space<vmem>>, %arg6: memref<10x32xf32, #tpu.memory_space<vmem>>) attributes {dimension_semantics = [#tpu.dimension_semantics<parallel>], iteration_bounds = array<i64: 1>, scalar_prefetch = 0 : i64, scratch_operands = 0 : i64, tpu.core_type = #tpu.core_type<tc>, window_params = [{transform_indices = @transform_0, window_bounds = array<i64: 10, 32>}, {pipeline_mode = #tpu.pipeline_mode<synchronous>, transform_indices = @transform_1, window_bounds = array<i64: 32, 128>}, {pipeline_mode = #tpu.pipeline_mode<synchronous>, transform_indices = @transform_2, window_bounds = array<i64: 1, 128>}, {pipeline_mode = #tpu.pipeline_mode<synchronous>, transform_indices = @transform_3, window_bounds = array<i64: 128, 32>}, {pipeline_mode = #tpu.pipeline_mode<synchronous>, transform_indices = @transform_4, window_bounds = array<i64: 1, 32>}, {transform_indices = @transform_5, window_bounds = array<i64: 10, 32>}]} {
    %c0 = arith.constant 0 : index
    %c0_0 = arith.constant 0 : index
    %0 = vector.load %arg1[%c0, %c0_0] : memref<10x32xf32, #tpu.memory_space<vmem>>, vector<10x32xf32>
    %1 = arith.truncf %0 : vector<10x32xf32> to vector<10x32xbf16>
    %c0_1 = arith.constant 0 : index
    %c0_2 = arith.constant 0 : index
    %2 = vector.load %arg2[%c0_1, %c0_2] : memref<32x128xbf16, #tpu.memory_space<vmem>>, vector<32x128xbf16>
    %cst = arith.constant dense<0.000000e+00> : vector<10x128xf32>
    %3 = tpu.matmul %1, %2, %cst {dimension_numbers = #tpu.dot_dimension_numbers<[1], [0], [0], [1], [0, 0, 1, 1], [], []>} : vector<10x32xbf16>, vector<32x128xbf16>, vector<10x128xf32> -> vector<10x128xf32>
    %c0_3 = arith.constant 0 : index
    %c0_4 = arith.constant 0 : index
    %4 = vector.load %arg3[%c0_3, %c0_4] : memref<1x128xf32, #tpu.memory_space<vmem>>, vector<1x128xf32>
    %5 = vector.broadcast %4 : vector<1x128xf32> to vector<10x128xf32>
    %6 = arith.addf %3, %5 : vector<10x128xf32>
    %cst_5 = arith.constant 5.000000e-01 : f32
    %7 = vector.broadcast %cst_5 : f32 to vector<10x128xf32>
    %8 = arith.mulf %7, %6 : vector<10x128xf32>
    %cst_6 = arith.constant 0.707106769 : f32
    %9 = vector.broadcast %cst_6 : f32 to vector<10x128xf32>
    %10 = arith.mulf %6, %9 : vector<10x128xf32>
    %11 = math.erf %10 : vector<10x128xf32>
    %cst_7 = arith.constant 1.000000e+00 : f32
    %12 = vector.broadcast %cst_7 : f32 to vector<10x128xf32>
    %13 = arith.addf %12, %11 : vector<10x128xf32>
    %14 = arith.mulf %8, %13 : vector<10x128xf32>
    %15 = arith.truncf %14 : vector<10x128xf32> to vector<10x128xbf16>
    %c0_8 = arith.constant 0 : index
    %c0_9 = arith.constant 0 : index
    %16 = vector.load %arg4[%c0_8, %c0_9] : memref<128x32xbf16, #tpu.memory_space<vmem>>, vector<128x32xbf16>
    %cst_10 = arith.constant dense<0.000000e+00> : vector<10x32xf32>
    %17 = tpu.matmul %15, %16, %cst_10 {dimension_numbers = #tpu.dot_dimension_numbers<[1], [0], [0], [1], [0, 0, 1, 1], [], []>} : vector<10x128xbf16>, vector<128x32xbf16>, vector<10x32xf32> -> vector<10x32xf32>
    %c0_11 = arith.constant 0 : index
    %c0_12 = arith.constant 0 : index
    %18 = vector.load %arg5[%c0_11, %c0_12] : memref<1x32xf32, #tpu.memory_space<vmem>>, vector<1x32xf32>
    %19 = vector.broadcast %18 : vector<1x32xf32> to vector<10x32xf32>
    %20 = arith.addf %17, %19 : vector<10x32xf32>
    %c0_13 = arith.constant 0 : index
    %c0_14 = arith.constant 0 : index
    %21 = vector.load %arg6[%c0_13, %c0_14] : memref<10x32xf32, #tpu.memory_space<vmem>>, vector<10x32xf32>
    tpu.vector_store %arg6[%c0_13, %c0_14], %20 {strides = array<i32>} : memref<10x32xf32, #tpu.memory_space<vmem>>, vector<10x32xf32>,
    return
  }
  func.func @transform_0(%arg0: i32) -> (i32, i32) {
    %c0_i32 = arith.constant 0 : i32
    %c0_i32_0 = arith.constant 0 : i32
    return %arg0, %c0_i32 : i32, i32
  }
  func.func @transform_1(%arg0: i32) -> (i32, i32) {
    %c0_i32 = arith.constant 0 : i32
    %c0_i32_0 = arith.constant 0 : i32
    %c0_i32_1 = arith.constant 0 : i32
    return %c0_i32, %c0_i32_0 : i32, i32
  }
  func.func @transform_2(%arg0: i32) -> (i32, i32) {
    %c0_i32 = arith.constant 0 : i32
    %c0_i32_0 = arith.constant 0 : i32
    %c0_i32_1 = arith.constant 0 : i32
    return %c0_i32, %c0_i32_0 : i32, i32
  }
  func.func @transform_3(%arg0: i32) -> (i32, i32) {
    %c0_i32 = arith.constant 0 : i32
    %c0_i32_0 = arith.constant 0 : i32
    %c0_i32_1 = arith.constant 0 : i32
    return %c0_i32, %c0_i32_0 : i32, i32
  }
  func.func @transform_4(%arg0: i32) -> (i32, i32) {
    %c0_i32 = arith.constant 0 : i32
    %c0_i32_0 = arith.constant 0 : i32
    %c0_i32_1 = arith.constant 0 : i32
    return %c0_i32, %c0_i32_0 : i32, i32
  }
  func.func @transform_5(%arg0: i32) -> (i32, i32) {
    %c0_i32 = arith.constant 0 : i32
    %c0_i32_0 = arith.constant 0 : i32
    return %arg0, %c0_i32 : i32, i32
  }
}

module attributes {stable_mosaic.version = 11 : i64} {
  func.func @_mha_out_ln_kernel(%arg0: i32, %arg1: memref<1x5x96xf32, #tpu.memory_space<vmem>>, %arg2: memref<1x5x32xf32, #tpu.memory_space<vmem>>, %arg3: memref<32x32xbf16, #tpu.memory_space<vmem>>, %arg4: memref<1x32xf32, #tpu.memory_space<vmem>>, %arg5: memref<1x32xf32, #tpu.memory_space<vmem>>, %arg6: memref<1x32xf32, #tpu.memory_space<vmem>>, %arg7: memref<1x1x32xf32, #tpu.memory_space<vmem>>, %arg8: memref<1x1x32xf32, #tpu.memory_space<vmem>>) attributes {dimension_semantics = [#tpu.dimension_semantics<parallel>], iteration_bounds = array<i64: 2>, scalar_prefetch = 0 : i64, scratch_operands = 0 : i64, tpu.core_type = #tpu.core_type<tc>, window_params = [{transform_indices = @transform_0, window_bounds = array<i64: 1, 5, 96>}, {transform_indices = @transform_1, window_bounds = array<i64: 1, 5, 32>}, {pipeline_mode = #tpu.pipeline_mode<synchronous>, transform_indices = @transform_2, window_bounds = array<i64: 32, 32>}, {pipeline_mode = #tpu.pipeline_mode<synchronous>, transform_indices = @transform_3, window_bounds = array<i64: 1, 32>}, {pipeline_mode = #tpu.pipeline_mode<synchronous>, transform_indices = @transform_4, window_bounds = array<i64: 1, 32>}, {pipeline_mode = #tpu.pipeline_mode<synchronous>, transform_indices = @transform_5, window_bounds = array<i64: 1, 32>}, {transform_indices = @transform_6, window_bounds = array<i64: 1, 1, 32>}, {transform_indices = @transform_7, window_bounds = array<i64: 1, 1, 32>}]} {
    %c0 = arith.constant 0 : index
    %c0_0 = arith.constant 0 : index
    %c0_1 = arith.constant 0 : index
    %0 = vector.load %arg1[%c0, %c0_0, %c0_1] : memref<1x5x96xf32, #tpu.memory_space<vmem>>, vector<1x5x96xf32>
    %1 = vector.shape_cast %0 : vector<1x5x96xf32> to vector<5x96xf32>
    %2 = vector.extract_strided_slice %1 {offsets = [0, 0], sizes = [1, 8], strides = [1, 1]} : vector<5x96xf32> to vector<1x8xf32>
    %cst = arith.constant 0.353553385 : f32
    %3 = vector.broadcast %cst : f32 to vector<1x8xf32>
    %4 = arith.mulf %2, %3 : vector<1x8xf32>
    %5 = arith.truncf %4 : vector<1x8xf32> to vector<1x8xbf16>
    %6 = vector.extract_strided_slice %1 {offsets = [0, 32], sizes = [5, 8], strides = [1, 1]} : vector<5x96xf32> to vector<5x8xf32>
    %7 = arith.truncf %6 : vector<5x8xf32> to vector<5x8xbf16>
    %8 = vector.extract_strided_slice %1 {offsets = [0, 64], sizes = [5, 8], strides = [1, 1]} : vector<5x96xf32> to vector<5x8xf32>
    %9 = arith.truncf %8 : vector<5x8xf32> to vector<5x8xbf16>
    %cst_2 = arith.constant dense<0.000000e+00> : vector<1x5xf32>
    %10 = tpu.matmul %5, %7, %cst_2 {dimension_numbers = #tpu.dot_dimension_numbers<[1], [1], [0], [0], [0, 0, 1, 0], [], []>} : vector<1x8xbf16>, vector<5x8xbf16>, vector<1x5xf32> -> vector<1x5xf32>
    %cst_3 = arith.constant dense<0xFF800000> : vector<1xf32>
    %11 = vector.multi_reduction <maximumf>, %10, %cst_3 [1] : vector<1x5xf32> to vector<1xf32>
    %12 = vector.shape_cast %11 : vector<1xf32> to vector<1x1xf32>
    %13 = vector.broadcast %12 : vector<1x1xf32> to vector<1x5xf32>
    %14 = arith.subf %10, %13 : vector<1x5xf32>
    %15 = math.exp %14 : vector<1x5xf32>
    %cst_4 = arith.constant dense<0.000000e+00> : vector<1xf32>
    %16 = vector.multi_reduction <add>, %15, %cst_4 [1] : vector<1x5xf32> to vector<1xf32>
    %17 = vector.shape_cast %16 : vector<1xf32> to vector<1x1xf32>
    %18 = arith.truncf %15 : vector<1x5xf32> to vector<1x5xbf16>
    %cst_5 = arith.constant dense<0.000000e+00> : vector<1x8xf32>
    %19 = tpu.matmul %18, %9, %cst_5 {dimension_numbers = #tpu.dot_dimension_numbers<[1], [0], [0], [1], [0, 0, 1, 1], [], []>} : vector<1x5xbf16>, vector<5x8xbf16>, vector<1x8xf32> -> vector<1x8xf32>
    %20 = tpu.reciprocal %17 {approx = true} : vector<1x1xf32> -> vector<1x1xf32>
    %21 = vector.broadcast %20 : vector<1x1xf32> to vector<1x8xf32>
    %22 = arith.mulf %19, %21 : vector<1x8xf32>
    %23 = vector.extract_strided_slice %1 {offsets = [0, 8], sizes = [1, 8], strides = [1, 1]} : vector<5x96xf32> to vector<1x8xf32>
    %cst_6 = arith.constant 0.353553385 : f32
    %24 = vector.broadcast %cst_6 : f32 to vector<1x8xf32>
    %25 = arith.mulf %23, %24 : vector<1x8xf32>
    %26 = arith.truncf %25 : vector<1x8xf32> to vector<1x8xbf16>
    %27 = vector.extract_strided_slice %1 {offsets = [0, 40], sizes = [5, 8], strides = [1, 1]} : vector<5x96xf32> to vector<5x8xf32>
    %28 = arith.truncf %27 : vector<5x8xf32> to vector<5x8xbf16>
    %29 = vector.extract_strided_slice %1 {offsets = [0, 72], sizes = [5, 8], strides = [1, 1]} : vector<5x96xf32> to vector<5x8xf32>
    %30 = arith.truncf %29 : vector<5x8xf32> to vector<5x8xbf16>
    %cst_7 = arith.constant dense<0.000000e+00> : vector<1x5xf32>
    %31 = tpu.matmul %26, %28, %cst_7 {dimension_numbers = #tpu.dot_dimension_numbers<[1], [1], [0], [0], [0, 0, 1, 0], [], []>} : vector<1x8xbf16>, vector<5x8xbf16>, vector<1x5xf32> -> vector<1x5xf32>
    %cst_8 = arith.constant dense<0xFF800000> : vector<1xf32>
    %32 = vector.multi_reduction <maximumf>, %31, %cst_8 [1] : vector<1x5xf32> to vector<1xf32>
    %33 = vector.shape_cast %32 : vector<1xf32> to vector<1x1xf32>
    %34 = vector.broadcast %33 : vector<1x1xf32> to vector<1x5xf32>
    %35 = arith.subf %31, %34 : vector<1x5xf32>
    %36 = math.exp %35 : vector<1x5xf32>
    %cst_9 = arith.constant dense<0.000000e+00> : vector<1xf32>
    %37 = vector.multi_reduction <add>, %36, %cst_9 [1] : vector<1x5xf32> to vector<1xf32>
    %38 = vector.shape_cast %37 : vector<1xf32> to vector<1x1xf32>
    %39 = arith.truncf %36 : vector<1x5xf32> to vector<1x5xbf16>
    %cst_10 = arith.constant dense<0.000000e+00> : vector<1x8xf32>
    %40 = tpu.matmul %39, %30, %cst_10 {dimension_numbers = #tpu.dot_dimension_numbers<[1], [0], [0], [1], [0, 0, 1, 1], [], []>} : vector<1x5xbf16>, vector<5x8xbf16>, vector<1x8xf32> -> vector<1x8xf32>
    %41 = tpu.reciprocal %38 {approx = true} : vector<1x1xf32> -> vector<1x1xf32>
    %42 = vector.broadcast %41 : vector<1x1xf32> to vector<1x8xf32>
    %43 = arith.mulf %40, %42 : vector<1x8xf32>
    %44 = vector.extract_strided_slice %1 {offsets = [0, 16], sizes = [1, 8], strides = [1, 1]} : vector<5x96xf32> to vector<1x8xf32>
    %cst_11 = arith.constant 0.353553385 : f32
    %45 = vector.broadcast %cst_11 : f32 to vector<1x8xf32>
    %46 = arith.mulf %44, %45 : vector<1x8xf32>
    %47 = arith.truncf %46 : vector<1x8xf32> to vector<1x8xbf16>
    %48 = vector.extract_strided_slice %1 {offsets = [0, 48], sizes = [5, 8], strides = [1, 1]} : vector<5x96xf32> to vector<5x8xf32>
    %49 = arith.truncf %48 : vector<5x8xf32> to vector<5x8xbf16>
    %50 = vector.extract_strided_slice %1 {offsets = [0, 80], sizes = [5, 8], strides = [1, 1]} : vector<5x96xf32> to vector<5x8xf32>
    %51 = arith.truncf %50 : vector<5x8xf32> to vector<5x8xbf16>
    %cst_12 = arith.constant dense<0.000000e+00> : vector<1x5xf32>
    %52 = tpu.matmul %47, %49, %cst_12 {dimension_numbers = #tpu.dot_dimension_numbers<[1], [1], [0], [0], [0, 0, 1, 0], [], []>} : vector<1x8xbf16>, vector<5x8xbf16>, vector<1x5xf32> -> vector<1x5xf32>
    %cst_13 = arith.constant dense<0xFF800000> : vector<1xf32>
    %53 = vector.multi_reduction <maximumf>, %52, %cst_13 [1] : vector<1x5xf32> to vector<1xf32>
    %54 = vector.shape_cast %53 : vector<1xf32> to vector<1x1xf32>
    %55 = vector.broadcast %54 : vector<1x1xf32> to vector<1x5xf32>
    %56 = arith.subf %52, %55 : vector<1x5xf32>
    %57 = math.exp %56 : vector<1x5xf32>
    %cst_14 = arith.constant dense<0.000000e+00> : vector<1xf32>
    %58 = vector.multi_reduction <add>, %57, %cst_14 [1] : vector<1x5xf32> to vector<1xf32>
    %59 = vector.shape_cast %58 : vector<1xf32> to vector<1x1xf32>
    %60 = arith.truncf %57 : vector<1x5xf32> to vector<1x5xbf16>
    %cst_15 = arith.constant dense<0.000000e+00> : vector<1x8xf32>
    %61 = tpu.matmul %60, %51, %cst_15 {dimension_numbers = #tpu.dot_dimension_numbers<[1], [0], [0], [1], [0, 0, 1, 1], [], []>} : vector<1x5xbf16>, vector<5x8xbf16>, vector<1x8xf32> -> vector<1x8xf32>
    %62 = tpu.reciprocal %59 {approx = true} : vector<1x1xf32> -> vector<1x1xf32>
    %63 = vector.broadcast %62 : vector<1x1xf32> to vector<1x8xf32>
    %64 = arith.mulf %61, %63 : vector<1x8xf32>
    %65 = vector.extract_strided_slice %1 {offsets = [0, 24], sizes = [1, 8], strides = [1, 1]} : vector<5x96xf32> to vector<1x8xf32>
    %cst_16 = arith.constant 0.353553385 : f32
    %66 = vector.broadcast %cst_16 : f32 to vector<1x8xf32>
    %67 = arith.mulf %65, %66 : vector<1x8xf32>
    %68 = arith.truncf %67 : vector<1x8xf32> to vector<1x8xbf16>
    %69 = vector.extract_strided_slice %1 {offsets = [0, 56], sizes = [5, 8], strides = [1, 1]} : vector<5x96xf32> to vector<5x8xf32>
    %70 = arith.truncf %69 : vector<5x8xf32> to vector<5x8xbf16>
    %71 = vector.extract_strided_slice %1 {offsets = [0, 88], sizes = [5, 8], strides = [1, 1]} : vector<5x96xf32> to vector<5x8xf32>
    %72 = arith.truncf %71 : vector<5x8xf32> to vector<5x8xbf16>
    %cst_17 = arith.constant dense<0.000000e+00> : vector<1x5xf32>
    %73 = tpu.matmul %68, %70, %cst_17 {dimension_numbers = #tpu.dot_dimension_numbers<[1], [1], [0], [0], [0, 0, 1, 0], [], []>} : vector<1x8xbf16>, vector<5x8xbf16>, vector<1x5xf32> -> vector<1x5xf32>
    %cst_18 = arith.constant dense<0xFF800000> : vector<1xf32>
    %74 = vector.multi_reduction <maximumf>, %73, %cst_18 [1] : vector<1x5xf32> to vector<1xf32>
    %75 = vector.shape_cast %74 : vector<1xf32> to vector<1x1xf32>
    %76 = vector.broadcast %75 : vector<1x1xf32> to vector<1x5xf32>
    %77 = arith.subf %73, %76 : vector<1x5xf32>
    %78 = math.exp %77 : vector<1x5xf32>
    %cst_19 = arith.constant dense<0.000000e+00> : vector<1xf32>
    %79 = vector.multi_reduction <add>, %78, %cst_19 [1] : vector<1x5xf32> to vector<1xf32>
    %80 = vector.shape_cast %79 : vector<1xf32> to vector<1x1xf32>
    %81 = arith.truncf %78 : vector<1x5xf32> to vector<1x5xbf16>
    %cst_20 = arith.constant dense<0.000000e+00> : vector<1x8xf32>
    %82 = tpu.matmul %81, %72, %cst_20 {dimension_numbers = #tpu.dot_dimension_numbers<[1], [0], [0], [1], [0, 0, 1, 1], [], []>} : vector<1x5xbf16>, vector<5x8xbf16>, vector<1x8xf32> -> vector<1x8xf32>
    %83 = tpu.reciprocal %80 {approx = true} : vector<1x1xf32> -> vector<1x1xf32>
    %84 = vector.broadcast %83 : vector<1x1xf32> to vector<1x8xf32>
    %85 = arith.mulf %82, %84 : vector<1x8xf32>
    %86 = tpu.concatenate %22, %43, %64, %85 in 1 : vector<1x8xf32>, vector<1x8xf32>, vector<1x8xf32>, vector<1x8xf32> -> vector<1x32xf32>
    %87 = arith.truncf %86 : vector<1x32xf32> to vector<1x32xbf16>
    %c0_21 = arith.constant 0 : index
    %c0_22 = arith.constant 0 : index
    %88 = vector.load %arg3[%c0_21, %c0_22] : memref<32x32xbf16, #tpu.memory_space<vmem>>, vector<32x32xbf16>
    %cst_23 = arith.constant dense<0.000000e+00> : vector<1x32xf32>
    %89 = tpu.matmul %87, %88, %cst_23 {dimension_numbers = #tpu.dot_dimension_numbers<[1], [0], [0], [1], [0, 0, 1, 1], [], []>} : vector<1x32xbf16>, vector<32x32xbf16>, vector<1x32xf32> -> vector<1x32xf32>
    %c0_24 = arith.constant 0 : index
    %c0_25 = arith.constant 0 : index
    %90 = vector.load %arg4[%c0_24, %c0_25] : memref<1x32xf32, #tpu.memory_space<vmem>>, vector<1x32xf32>
    %91 = arith.addf %89, %90 : vector<1x32xf32>
    %c0_26 = arith.constant 0 : index
    %c0_27 = arith.constant 0 : index
    %c0_28 = arith.constant 0 : index
    %92 = vector.load %arg2[%c0_26, %c0_27, %c0_28] : memref<1x5x32xf32, #tpu.memory_space<vmem>>, vector<1x5x32xf32>
    %93 = vector.shape_cast %92 : vector<1x5x32xf32> to vector<5x32xf32>
    %94 = vector.extract_strided_slice %93 {offsets = [0, 0], sizes = [1, 32], strides = [1, 1]} : vector<5x32xf32> to vector<1x32xf32>
    %95 = arith.addf %91, %94 : vector<1x32xf32>
    %c0_29 = arith.constant 0 : index
    %c0_30 = arith.constant 0 : index
    %c0_31 = arith.constant 0 : index
    %96 = vector.load %arg8[%c0_29, %c0_30, %c0_31] : memref<1x1x32xf32, #tpu.memory_space<vmem>>, vector<1x1x32xf32>
    %97 = vector.shape_cast %96 : vector<1x1x32xf32> to vector<1x32xf32>
    %98 = vector.shape_cast %95 : vector<1x32xf32> to vector<1x1x32xf32>
    tpu.vector_store %arg8[%c0_29, %c0_30, %c0_31], %98 {strides = array<i32>} : memref<1x1x32xf32, #tpu.memory_space<vmem>>, vector<1x1x32xf32>,
    %c0_32 = arith.constant 0 : index
    %c0_33 = arith.constant 0 : index
    %99 = vector.load %arg5[%c0_32, %c0_33] : memref<1x32xf32, #tpu.memory_space<vmem>>, vector<1x32xf32>
    %c0_34 = arith.constant 0 : index
    %c0_35 = arith.constant 0 : index
    %100 = vector.load %arg6[%c0_34, %c0_35] : memref<1x32xf32, #tpu.memory_space<vmem>>, vector<1x32xf32>
    %cst_36 = arith.constant dense<0.000000e+00> : vector<1xf32>
    %101 = vector.multi_reduction <add>, %95, %cst_36 [1] : vector<1x32xf32> to vector<1xf32>
    %102 = vector.shape_cast %101 : vector<1xf32> to vector<1x1xf32>
    %cst_37 = arith.constant 3.200000e+01 : f32
    %103 = vector.broadcast %cst_37 : f32 to vector<1x1xf32>
    %104 = arith.divf %102, %103 : vector<1x1xf32>
    %105 = vector.broadcast %104 : vector<1x1xf32> to vector<1x32xf32>
    %106 = arith.subf %95, %105 : vector<1x32xf32>
    %107 = arith.mulf %106, %106 : vector<1x32xf32>
    %cst_38 = arith.constant dense<0.000000e+00> : vector<1xf32>
    %108 = vector.multi_reduction <add>, %107, %cst_38 [1] : vector<1x32xf32> to vector<1xf32>
    %109 = vector.shape_cast %108 : vector<1xf32> to vector<1x1xf32>
    %cst_39 = arith.constant 3.200000e+01 : f32
    %110 = vector.broadcast %cst_39 : f32 to vector<1x1xf32>
    %111 = arith.divf %109, %110 : vector<1x1xf32>
    %112 = vector.broadcast %104 : vector<1x1xf32> to vector<1x32xf32>
    %113 = arith.subf %95, %112 : vector<1x32xf32>
    %cst_40 = arith.constant 9.99999997E-7 : f32
    %114 = vector.broadcast %cst_40 : f32 to vector<1x1xf32>
    %115 = arith.addf %111, %114 : vector<1x1xf32>
    %116 = math.rsqrt %115 : vector<1x1xf32>
    %117 = vector.broadcast %116 : vector<1x1xf32> to vector<1x32xf32>
    %118 = arith.mulf %113, %117 : vector<1x32xf32>
    %119 = arith.mulf %118, %99 : vector<1x32xf32>
    %120 = arith.addf %119, %100 : vector<1x32xf32>
    %c0_41 = arith.constant 0 : index
    %c0_42 = arith.constant 0 : index
    %c0_43 = arith.constant 0 : index
    %121 = vector.load %arg7[%c0_41, %c0_42, %c0_43] : memref<1x1x32xf32, #tpu.memory_space<vmem>>, vector<1x1x32xf32>
    %122 = vector.shape_cast %121 : vector<1x1x32xf32> to vector<1x32xf32>
    %123 = vector.shape_cast %120 : vector<1x32xf32> to vector<1x1x32xf32>
    tpu.vector_store %arg7[%c0_41, %c0_42, %c0_43], %123 {strides = array<i32>} : memref<1x1x32xf32, #tpu.memory_space<vmem>>, vector<1x1x32xf32>,
    return
  }
  func.func @transform_0(%arg0: i32) -> (i32, i32, i32) {
    %c0_i32 = arith.constant 0 : i32
    %c0_i32_0 = arith.constant 0 : i32
    %c0_i32_1 = arith.constant 0 : i32
    return %arg0, %c0_i32, %c0_i32_0 : i32, i32, i32
  }
  func.func @transform_1(%arg0: i32) -> (i32, i32, i32) {
    %c0_i32 = arith.constant 0 : i32
    %c0_i32_0 = arith.constant 0 : i32
    %c0_i32_1 = arith.constant 0 : i32
    return %arg0, %c0_i32, %c0_i32_0 : i32, i32, i32
  }
  func.func @transform_2(%arg0: i32) -> (i32, i32) {
    %c0_i32 = arith.constant 0 : i32
    %c0_i32_0 = arith.constant 0 : i32
    %c0_i32_1 = arith.constant 0 : i32
    return %c0_i32, %c0_i32_0 : i32, i32
  }
  func.func @transform_3(%arg0: i32) -> (i32, i32) {
    %c0_i32 = arith.constant 0 : i32
    %c0_i32_0 = arith.constant 0 : i32
    %c0_i32_1 = arith.constant 0 : i32
    return %c0_i32, %c0_i32_0 : i32, i32
  }
  func.func @transform_4(%arg0: i32) -> (i32, i32) {
    %c0_i32 = arith.constant 0 : i32
    %c0_i32_0 = arith.constant 0 : i32
    %c0_i32_1 = arith.constant 0 : i32
    return %c0_i32, %c0_i32_0 : i32, i32
  }
  func.func @transform_5(%arg0: i32) -> (i32, i32) {
    %c0_i32 = arith.constant 0 : i32
    %c0_i32_0 = arith.constant 0 : i32
    %c0_i32_1 = arith.constant 0 : i32
    return %c0_i32, %c0_i32_0 : i32, i32
  }
  func.func @transform_6(%arg0: i32) -> (i32, i32, i32) {
    %c0_i32 = arith.constant 0 : i32
    %c0_i32_0 = arith.constant 0 : i32
    %c0_i32_1 = arith.constant 0 : i32
    return %arg0, %c0_i32, %c0_i32_0 : i32, i32, i32
  }
  func.func @transform_7(%arg0: i32) -> (i32, i32, i32) {
    %c0_i32 = arith.constant 0 : i32
    %c0_i32_0 = arith.constant 0 : i32
    %c0_i32_1 = arith.constant 0 : i32
    return %arg0, %c0_i32, %c0_i32_0 : i32, i32, i32
  }
}

module attributes {stable_mosaic.version = 11 : i64} {
  func.func @_mlp_kernel(%arg0: i32, %arg1: memref<2x32xf32, #tpu.memory_space<vmem>>, %arg2: memref<32x128xbf16, #tpu.memory_space<vmem>>, %arg3: memref<1x128xf32, #tpu.memory_space<vmem>>, %arg4: memref<128x32xbf16, #tpu.memory_space<vmem>>, %arg5: memref<1x32xf32, #tpu.memory_space<vmem>>, %arg6: memref<2x32xf32, #tpu.memory_space<vmem>>) attributes {dimension_semantics = [#tpu.dimension_semantics<parallel>], iteration_bounds = array<i64: 1>, scalar_prefetch = 0 : i64, scratch_operands = 0 : i64, tpu.core_type = #tpu.core_type<tc>, window_params = [{transform_indices = @transform_0, window_bounds = array<i64: 2, 32>}, {pipeline_mode = #tpu.pipeline_mode<synchronous>, transform_indices = @transform_1, window_bounds = array<i64: 32, 128>}, {pipeline_mode = #tpu.pipeline_mode<synchronous>, transform_indices = @transform_2, window_bounds = array<i64: 1, 128>}, {pipeline_mode = #tpu.pipeline_mode<synchronous>, transform_indices = @transform_3, window_bounds = array<i64: 128, 32>}, {pipeline_mode = #tpu.pipeline_mode<synchronous>, transform_indices = @transform_4, window_bounds = array<i64: 1, 32>}, {transform_indices = @transform_5, window_bounds = array<i64: 2, 32>}]} {
    %c0 = arith.constant 0 : index
    %c0_0 = arith.constant 0 : index
    %0 = vector.load %arg1[%c0, %c0_0] : memref<2x32xf32, #tpu.memory_space<vmem>>, vector<2x32xf32>
    %1 = arith.truncf %0 : vector<2x32xf32> to vector<2x32xbf16>
    %c0_1 = arith.constant 0 : index
    %c0_2 = arith.constant 0 : index
    %2 = vector.load %arg2[%c0_1, %c0_2] : memref<32x128xbf16, #tpu.memory_space<vmem>>, vector<32x128xbf16>
    %cst = arith.constant dense<0.000000e+00> : vector<2x128xf32>
    %3 = tpu.matmul %1, %2, %cst {dimension_numbers = #tpu.dot_dimension_numbers<[1], [0], [0], [1], [0, 0, 1, 1], [], []>} : vector<2x32xbf16>, vector<32x128xbf16>, vector<2x128xf32> -> vector<2x128xf32>
    %c0_3 = arith.constant 0 : index
    %c0_4 = arith.constant 0 : index
    %4 = vector.load %arg3[%c0_3, %c0_4] : memref<1x128xf32, #tpu.memory_space<vmem>>, vector<1x128xf32>
    %5 = vector.broadcast %4 : vector<1x128xf32> to vector<2x128xf32>
    %6 = arith.addf %3, %5 : vector<2x128xf32>
    %cst_5 = arith.constant 5.000000e-01 : f32
    %7 = vector.broadcast %cst_5 : f32 to vector<2x128xf32>
    %8 = arith.mulf %7, %6 : vector<2x128xf32>
    %cst_6 = arith.constant 0.707106769 : f32
    %9 = vector.broadcast %cst_6 : f32 to vector<2x128xf32>
    %10 = arith.mulf %6, %9 : vector<2x128xf32>
    %11 = math.erf %10 : vector<2x128xf32>
    %cst_7 = arith.constant 1.000000e+00 : f32
    %12 = vector.broadcast %cst_7 : f32 to vector<2x128xf32>
    %13 = arith.addf %12, %11 : vector<2x128xf32>
    %14 = arith.mulf %8, %13 : vector<2x128xf32>
    %15 = arith.truncf %14 : vector<2x128xf32> to vector<2x128xbf16>
    %c0_8 = arith.constant 0 : index
    %c0_9 = arith.constant 0 : index
    %16 = vector.load %arg4[%c0_8, %c0_9] : memref<128x32xbf16, #tpu.memory_space<vmem>>, vector<128x32xbf16>
    %cst_10 = arith.constant dense<0.000000e+00> : vector<2x32xf32>
    %17 = tpu.matmul %15, %16, %cst_10 {dimension_numbers = #tpu.dot_dimension_numbers<[1], [0], [0], [1], [0, 0, 1, 1], [], []>} : vector<2x128xbf16>, vector<128x32xbf16>, vector<2x32xf32> -> vector<2x32xf32>
    %c0_11 = arith.constant 0 : index
    %c0_12 = arith.constant 0 : index
    %18 = vector.load %arg5[%c0_11, %c0_12] : memref<1x32xf32, #tpu.memory_space<vmem>>, vector<1x32xf32>
    %19 = vector.broadcast %18 : vector<1x32xf32> to vector<2x32xf32>
    %20 = arith.addf %17, %19 : vector<2x32xf32>
    %c0_13 = arith.constant 0 : index
    %c0_14 = arith.constant 0 : index
    %21 = vector.load %arg6[%c0_13, %c0_14] : memref<2x32xf32, #tpu.memory_space<vmem>>, vector<2x32xf32>
    tpu.vector_store %arg6[%c0_13, %c0_14], %20 {strides = array<i32>} : memref<2x32xf32, #tpu.memory_space<vmem>>, vector<2x32xf32>,
    return
  }
  func.func @transform_0(%arg0: i32) -> (i32, i32) {
    %c0_i32 = arith.constant 0 : i32
    %c0_i32_0 = arith.constant 0 : i32
    return %arg0, %c0_i32 : i32, i32
  }
  func.func @transform_1(%arg0: i32) -> (i32, i32) {
    %c0_i32 = arith.constant 0 : i32
    %c0_i32_0 = arith.constant 0 : i32
    %c0_i32_1 = arith.constant 0 : i32
    return %c0_i32, %c0_i32_0 : i32, i32
  }
  func.func @transform_2(%arg0: i32) -> (i32, i32) {
    %c0_i32 = arith.constant 0 : i32
    %c0_i32_0 = arith.constant 0 : i32
    %c0_i32_1 = arith.constant 0 : i32
    return %c0_i32, %c0_i32_0 : i32, i32
  }
  func.func @transform_3(%arg0: i32) -> (i32, i32) {
    %c0_i32 = arith.constant 0 : i32
    %c0_i32_0 = arith.constant 0 : i32
    %c0_i32_1 = arith.constant 0 : i32
    return %c0_i32, %c0_i32_0 : i32, i32
  }
  func.func @transform_4(%arg0: i32) -> (i32, i32) {
    %c0_i32 = arith.constant 0 : i32
    %c0_i32_0 = arith.constant 0 : i32
    %c0_i32_1 = arith.constant 0 : i32
    return %c0_i32, %c0_i32_0 : i32, i32
  }
  func.func @transform_5(%arg0: i32) -> (i32, i32) {
    %c0_i32 = arith.constant 0 : i32
    %c0_i32_0 = arith.constant 0 : i32
    return %arg0, %c0_i32 : i32, i32
  }
}

module attributes {stable_mosaic.version = 11 : i64} {
  func.func @_add_ln_matmul_kernel(%arg0: i32, %arg1: memref<2x32xf32, #tpu.memory_space<vmem>>, %arg2: memref<2x32xf32, #tpu.memory_space<vmem>>, %arg3: memref<1x32xf32, #tpu.memory_space<vmem>>, %arg4: memref<1x32xf32, #tpu.memory_space<vmem>>, %arg5: memref<32x8xbf16, #tpu.memory_space<vmem>>, %arg6: memref<1x8xf32, #tpu.memory_space<vmem>>, %arg7: memref<2x8xf32, #tpu.memory_space<vmem>>, %arg8: memref<2x32xf32, #tpu.memory_space<vmem>>) attributes {dimension_semantics = [#tpu.dimension_semantics<parallel>], iteration_bounds = array<i64: 1>, scalar_prefetch = 0 : i64, scratch_operands = 0 : i64, tpu.core_type = #tpu.core_type<tc>, window_params = [{transform_indices = @transform_0, window_bounds = array<i64: 2, 32>}, {transform_indices = @transform_1, window_bounds = array<i64: 2, 32>}, {pipeline_mode = #tpu.pipeline_mode<synchronous>, transform_indices = @transform_2, window_bounds = array<i64: 1, 32>}, {pipeline_mode = #tpu.pipeline_mode<synchronous>, transform_indices = @transform_3, window_bounds = array<i64: 1, 32>}, {pipeline_mode = #tpu.pipeline_mode<synchronous>, transform_indices = @transform_4, window_bounds = array<i64: 32, 8>}, {pipeline_mode = #tpu.pipeline_mode<synchronous>, transform_indices = @transform_5, window_bounds = array<i64: 1, 8>}, {transform_indices = @transform_6, window_bounds = array<i64: 2, 8>}, {transform_indices = @transform_7, window_bounds = array<i64: 2, 32>}]} {
    %c0 = arith.constant 0 : index
    %c0_0 = arith.constant 0 : index
    %0 = vector.load %arg1[%c0, %c0_0] : memref<2x32xf32, #tpu.memory_space<vmem>>, vector<2x32xf32>
    %c0_1 = arith.constant 0 : index
    %c0_2 = arith.constant 0 : index
    %1 = vector.load %arg2[%c0_1, %c0_2] : memref<2x32xf32, #tpu.memory_space<vmem>>, vector<2x32xf32>
    %2 = arith.addf %0, %1 : vector<2x32xf32>
    %c0_3 = arith.constant 0 : index
    %c0_4 = arith.constant 0 : index
    %3 = vector.load %arg8[%c0_3, %c0_4] : memref<2x32xf32, #tpu.memory_space<vmem>>, vector<2x32xf32>
    tpu.vector_store %arg8[%c0_3, %c0_4], %2 {strides = array<i32>} : memref<2x32xf32, #tpu.memory_space<vmem>>, vector<2x32xf32>,
    %c0_5 = arith.constant 0 : index
    %c0_6 = arith.constant 0 : index
    %4 = vector.load %arg3[%c0_5, %c0_6] : memref<1x32xf32, #tpu.memory_space<vmem>>, vector<1x32xf32>
    %c0_7 = arith.constant 0 : index
    %c0_8 = arith.constant 0 : index
    %5 = vector.load %arg4[%c0_7, %c0_8] : memref<1x32xf32, #tpu.memory_space<vmem>>, vector<1x32xf32>
    %cst = arith.constant dense<0.000000e+00> : vector<2xf32>
    %6 = vector.multi_reduction <add>, %2, %cst [1] : vector<2x32xf32> to vector<2xf32>
    %7 = vector.shape_cast %6 : vector<2xf32> to vector<2x1xf32>
    %cst_9 = arith.constant 3.200000e+01 : f32
    %8 = vector.broadcast %cst_9 : f32 to vector<2x1xf32>
    %9 = arith.divf %7, %8 : vector<2x1xf32>
    %10 = vector.broadcast %9 : vector<2x1xf32> to vector<2x32xf32>
    %11 = arith.subf %2, %10 : vector<2x32xf32>
    %12 = arith.mulf %11, %11 : vector<2x32xf32>
    %cst_10 = arith.constant dense<0.000000e+00> : vector<2xf32>
    %13 = vector.multi_reduction <add>, %12, %cst_10 [1] : vector<2x32xf32> to vector<2xf32>
    %14 = vector.shape_cast %13 : vector<2xf32> to vector<2x1xf32>
    %cst_11 = arith.constant 3.200000e+01 : f32
    %15 = vector.broadcast %cst_11 : f32 to vector<2x1xf32>
    %16 = arith.divf %14, %15 : vector<2x1xf32>
    %17 = vector.broadcast %9 : vector<2x1xf32> to vector<2x32xf32>
    %18 = arith.subf %2, %17 : vector<2x32xf32>
    %cst_12 = arith.constant 9.99999997E-7 : f32
    %19 = vector.broadcast %cst_12 : f32 to vector<2x1xf32>
    %20 = arith.addf %16, %19 : vector<2x1xf32>
    %21 = math.rsqrt %20 : vector<2x1xf32>
    %22 = vector.broadcast %21 : vector<2x1xf32> to vector<2x32xf32>
    %23 = arith.mulf %18, %22 : vector<2x32xf32>
    %24 = vector.broadcast %4 : vector<1x32xf32> to vector<2x32xf32>
    %25 = arith.mulf %23, %24 : vector<2x32xf32>
    %26 = vector.broadcast %5 : vector<1x32xf32> to vector<2x32xf32>
    %27 = arith.addf %25, %26 : vector<2x32xf32>
    %28 = arith.truncf %27 : vector<2x32xf32> to vector<2x32xbf16>
    %c0_13 = arith.constant 0 : index
    %c0_14 = arith.constant 0 : index
    %29 = vector.load %arg5[%c0_13, %c0_14] : memref<32x8xbf16, #tpu.memory_space<vmem>>, vector<32x8xbf16>
    %cst_15 = arith.constant dense<0.000000e+00> : vector<2x8xf32>
    %30 = tpu.matmul %28, %29, %cst_15 {dimension_numbers = #tpu.dot_dimension_numbers<[1], [0], [0], [1], [0, 0, 1, 1], [], []>} : vector<2x32xbf16>, vector<32x8xbf16>, vector<2x8xf32> -> vector<2x8xf32>
    %c0_16 = arith.constant 0 : index
    %c0_17 = arith.constant 0 : index
    %31 = vector.load %arg6[%c0_16, %c0_17] : memref<1x8xf32, #tpu.memory_space<vmem>>, vector<1x8xf32>
    %32 = vector.broadcast %31 : vector<1x8xf32> to vector<2x8xf32>
    %33 = arith.addf %30, %32 : vector<2x8xf32>
    %c0_18 = arith.constant 0 : index
    %c0_19 = arith.constant 0 : index
    %34 = vector.load %arg7[%c0_18, %c0_19] : memref<2x8xf32, #tpu.memory_space<vmem>>, vector<2x8xf32>
    tpu.vector_store %arg7[%c0_18, %c0_19], %33 {strides = array<i32>} : memref<2x8xf32, #tpu.memory_space<vmem>>, vector<2x8xf32>,
    return
  }
  func.func @transform_0(%arg0: i32) -> (i32, i32) {
    %c0_i32 = arith.constant 0 : i32
    %c0_i32_0 = arith.constant 0 : i32
    return %arg0, %c0_i32 : i32, i32
  }
  func.func @transform_1(%arg0: i32) -> (i32, i32) {
    %c0_i32 = arith.constant 0 : i32
    %c0_i32_0 = arith.constant 0 : i32
    return %arg0, %c0_i32 : i32, i32
  }
  func.func @transform_2(%arg0: i32) -> (i32, i32) {
    %c0_i32 = arith.constant 0 : i32
    %c0_i32_0 = arith.constant 0 : i32
    %c0_i32_1 = arith.constant 0 : i32
    return %c0_i32, %c0_i32_0 : i32, i32
  }
  func.func @transform_3(%arg0: i32) -> (i32, i32) {
    %c0_i32 = arith.constant 0 : i32
    %c0_i32_0 = arith.constant 0 : i32
    %c0_i32_1 = arith.constant 0 : i32
    return %c0_i32, %c0_i32_0 : i32, i32
  }
  func.func @transform_4(%arg0: i32) -> (i32, i32) {
    %c0_i32 = arith.constant 0 : i32
    %c0_i32_0 = arith.constant 0 : i32
    %c0_i32_1 = arith.constant 0 : i32
    return %c0_i32, %c0_i32_0 : i32, i32
  }
  func.func @transform_5(%arg0: i32) -> (i32, i32) {
    %c0_i32 = arith.constant 0 : i32
    %c0_i32_0 = arith.constant 0 : i32
    %c0_i32_1 = arith.constant 0 : i32
    return %c0_i32, %c0_i32_0 : i32, i32
  }
  func.func @transform_6(%arg0: i32) -> (i32, i32) {
    %c0_i32 = arith.constant 0 : i32
    %c0_i32_0 = arith.constant 0 : i32
    return %arg0, %c0_i32 : i32, i32
  }
  func.func @transform_7(%arg0: i32) -> (i32, i32) {
    %c0_i32 = arith.constant 0 : i32
    %c0_i32_0 = arith.constant 0 : i32
    return %arg0, %c0_i32 : i32, i32
  }
}

</mosaic_0001>

<bundles_post_ra>
// kernel: _lambda_.9
= control target key start
LH: loop header
LB: loop body
LE: loop exit
PB: predicated region body
PF: predicated region fallthrough
CT: control target
= control target key end

     0   :  { %vm32_vm0 = vcmask 261120   ;;  %vm34_vm1 = vcmask 254976   ;;  %v186_v18 = vmov 0.0   ;;  %vm187_vm2 = vmmov 0   ;;  %s274_s0 = inlined_call_operand.vmem [shape: f32[10,32], index: 0, kind: input, shape index: {}]   ;;  %s275_s1 = inlined_call_operand.vmem [shape: f32[10,32], index: 1, kind: input, shape index: {}]   ;;  %s276_s7 = inlined_call_operand.vmem [shape: f32[10,32], index: 7, kind: output, shape index: {1}]   ;;  %s277_s4 = inlined_call_operand.vmem [shape: bf16[32,96], index: 4, kind: input, shape index: {}]   ;;  %s278_s2 = inlined_call_operand.vmem [shape: f32[1,32], index: 2, kind: input, shape index: {}]   ;;  %s279_s3 = inlined_call_operand.vmem [shape: f32[1,32], index: 3, kind: input, shape index: {}]   ;;  %s280_s5 = inlined_call_operand.vmem [shape: f32[1,96], index: 5, kind: input, shape index: {}]   ;;  %s281_s6 = inlined_call_operand.vmem [shape: f32[10,96], index: 6, kind: output, shape index: {0}]  }
   0x1   :  { %v26_v0 = vld [vmem:[%s274_s0] sm:$0xff]  ;;  %v27_v2 = vld [vmem:[%s274_s0 + $0x8] sm:$0x3]  ;;  %170 = vmatprep.subr.bf16.mxu0 %v186_v18  ;;  %174 = vmatprep.mubr.msk.bf16.mxu0 %vm187_vm2, %v186_v18  ;;  %vm149_vm3 = vcmask 785408   ;;  %vm151_vm4 = vcmask 779264  }
   0x2   :  { %v28_v1 = vld [vmem:[%s275_s1] sm:$0xff]  ;;  %v29_v4 = vld [vmem:[%s275_s1 + $0x8] sm:$0x3] }
   0x3   :  { %v30_v3 = vadd.f32 %v28_v1, %v26_v0  ;;  %v31_v5 = vadd.f32 %v29_v4, %v27_v2  ;;  %v180_v19 = vld [vmem:[%s277_s4 + $0x8] sm:$0xff]   ;;  %v181_v20 = vld [vmem:[%s277_s4] sm:$0xff]  }
   0x4   :  { %171 = vmatpush3.bf16.msra.mxu0 %v180_v19  ;;  %v161_v29 = vld [vmem:[%s278_s2] ss:$0 sm:$0xff] }
   0x5   :  { %v38_v6 = vsel %vm32_vm0, %v30_v3, 0.0  ;;  %33 = vst.msk [vmem:[%s276_s7] sm:$0xff] %vm32_vm0, %v30_v3  ;;  %v41_v7 = vsel %vm34_vm1, %v31_v5, 0.0  ;;  %172 = vmatprep.subr.bf16.mxu0 %v186_v18  ;;  %v162_v33 = vld [vmem:[%s279_s3] ss:$0 sm:$0xff] }
   0x6   :  { %39 = vadd.xlane.f32.xlu0 %v38_v6  ;;  %35 = vst.msk [vmem:[%s276_s7 + $0x8] sm:$0x3] %vm34_vm1, %v31_v5  ;;  %v163_v38 = vld [vmem:[%s280_s5] ss:$0 sm:$0xff] }
   0x8   :  { %173 = vmatpush3.bf16.msra.mxu0 %v181_v20 }
   0xa   :  { %42 = vadd.xlane.f32.xlu0 %v41_v7 }
  0x8f   :  { %v40_v8 = vpop.xlane.xlu0 %39 }
  0x90   :  { %v45_v9 = vmul.f32 0.03125, %v40_v8 }
  0x92   :  { %v47_v10 = vsub.f32 %v30_v3, %v45_v9 }
  0x93   :  { %v43_v11 = vpop.xlane.xlu0 %42 }
  0x94   :  { %v46_v12 = vmul.f32 0.03125, %v43_v11  ;;  %v49_v13 = vmul.f32 %v47_v10, %v47_v10 }
  0x96   :  { %v48_v14 = vsub.f32 %v31_v5, %v46_v12  ;;  %v51_v15 = vsel %vm32_vm0, %v49_v13, 0.0 }
  0x97   :  { %52 = vadd.xlane.f32.xlu1 %v51_v15 }
  0x98   :  { %v50_v16 = vmul.f32 %v48_v14, %v48_v14 }
  0x9a   :  { %v54_v17 = vsel %vm34_vm1, %v50_v16, 0.0 }
  0x9b   :  { %55 = vadd.xlane.f32.xlu1 %v54_v17 }
 0x120   :  { %v53_v21 = vpop.xlane.xlu1 %52 }
 0x121   :  { %v57_v22 = vmul.f32 0.03125, %v53_v21 }
 0x123   :  { %v59_v23 = vadd.f32 1e-06, %v57_v22 }
 0x124   :  { %v56_v24 = vpop.xlane.xlu1 %55 }
 0x125   :  { %182 = vrsqrt.f32 %v59_v23  ;;  %v58_v25 = vmul.f32 0.03125, %v56_v24 }
 0x127   :  { %v60_v26 = vadd.f32 1e-06, %v58_v25 }
 0x129   :  { %184 = vrsqrt.f32 %v60_v26 }
 0x132   :  { %v183_v27 = vpop.eup %182 }
 0x133   :  { %v63_v28 = vmul.f32 %v183_v27, %v47_v10 }
 0x135   :  { %v71_v32 = vmul.f32 %v161_v29, %v63_v28 }
 0x136   :  { %v185_v30 = vpop.eup %184 }
 0x137   :  { %v64_v31 = vmul.f32 %v185_v30, %v48_v14  ;;  %v79_v35 = vadd.f32 %v162_v33, %v71_v32 }
 0x139   :  { %v72_v34 = vmul.f32 %v161_v29, %v64_v31 }
 0x13b   :  { %v80_v36 = vadd.f32 %v162_v33, %v72_v34 }
 0x13d   :  { %v81_v37 = vpack.c.bf16 %v80_v36, %v79_v35 }
 0x13f   :  { %175 = vmatmul.mubr.msk.bf16.vlgmr.msra.gmra.mxu0 %vm32_vm0, %v81_v37 }
 0x1ff   :  { %v142_v39 = vpop.f32.mrf.mxu0 }
 0x200   :  { %v143_v40 = vadd.f32 %v163_v38, %v142_v39 }
 0x201   :  { %v176_v41 = vpop.f32.mrf.mxu0 }
 0x202   :  { %150 = vst.msk [vmem:[%s281_s6] sm:$0xff] %vm149_vm3, %v143_v40 }
 0x203   :  { %v145_v42 = vpop.f32.mrf.mxu0 }
 0x204   :  { %v146_v43 = vadd.f32 %v163_v38, %v145_v42 }
 0x205   :  { %v177_v44 = vpop.f32.mrf.mxu0 }
 0x206   :  { %152 = vst.msk [vmem:[%s281_s6 + $0x8] sm:$0x3] %vm151_vm4, %v146_v43 }

// kernel: _lambda_.8
= control target key start
LH: loop header
LB: loop body
LE: loop exit
PB: predicated region body
PF: predicated region fallthrough
CT: control target
= control target key end

     0   :  { %vm19_vm0 = vcmask 261120   ;;  %v270_v20 = vmov 0.0   ;;  %s354_s1 = inlined_call_operand.vmem [shape: bf16[256,32], index: 1, kind: input, shape index: {}]   ;;  %s355_s0 = inlined_call_operand.vmem [shape: f32[8,256], index: 0, kind: input, shape index: {}]   ;;  %s356_s2 = inlined_call_operand.vmem [shape: f32[1,32], index: 2, kind: input, shape index: {}]   ;;  %s357_s3 = inlined_call_operand.vmem [shape: f32[8,32], index: 3, kind: output, shape index: {}]  }
   0x1   :  { %v254_v0 = vld [vmem:[%s354_s1 + $0x78] sm:$0xff]   ;;  %v256_v2 = vld [vmem:[%s354_s1 + $0x70] sm:$0xff]   ;;  %v258_v4 = vld [vmem:[%s354_s1 + $0x68] sm:$0xff]   ;;  %20 = vst.msk [vmem:[#allocation2] sm:$0xff] %vm19_vm0, %v270_v20 }
   0x2   :  { %v255_v1 = vld [vmem:[%s354_s1 + $0x38] sm:$0xff]   ;;  %231 = vmatprep.subr.bf16.mxu0 %v254_v0  ;;  %v257_v3 = vld [vmem:[%s354_s1 + $0x30] sm:$0xff]   ;;  %v259_v5 = vld [vmem:[%s354_s1 + $0x28] sm:$0xff]  }
   0x3   :  { %232 = vmatpush3.bf16.msra.mxu0 %v255_v1  ;;  %v260_v6 = vld [vmem:[%s354_s1 + $0x60] sm:$0xff]   ;;  %v262_v8 = vld [vmem:[%s354_s1 + $0x58] sm:$0xff]   ;;  %v264_v10 = vld [vmem:[%s354_s1 + $0x50] sm:$0xff]  }
   0x4   :  { %233 = vmatprep.subr.bf16.mxu0 %v256_v2  ;;  %v261_v7 = vld [vmem:[%s354_s1 + $0x20] sm:$0xff]   ;;  %v263_v9 = vld [vmem:[%s354_s1 + $0x18] sm:$0xff]   ;;  %v23_v11 = vld [vmem:[%s355_s0 + $0x8] sm:$0xff] }
   0x5   :  { %v25_v12 = vpack.c.bf16 %v23_v11, %v23_v11  ;;  %v265_v13 = vld [vmem:[%s354_s1 + $0x10] sm:$0xff]   ;;  %v266_v14 = vld [vmem:[%s354_s1 + $0x48] sm:$0xff]   ;;  %v268_v16 = vld [vmem:[%s354_s1 + $0x40] sm:$0xff]  }
   0x6   :  { %v267_v15 = vld [vmem:[%s354_s1 + $0x8] sm:$0xff]   ;;  %v269_v17 = vld [vmem:[%s354_s1] sm:$0xff]  }
   0x7   :  { %234 = vmatpush3.bf16.msra.mxu0 %v257_v3  ;;  %186 = vmatprep.mubr.bf16.mxu0 %v25_v12  ;;  %v22_v18 = vld [vmem:[%s355_s0] sm:$0xff] }
   0x8   :  { %235 = vmatprep.subr.bf16.mxu0 %v258_v4  ;;  %v24_v19 = vpack.c.bf16 %v22_v18, %v22_v18  ;;  %v21_v22 = vld [vmem:[#allocation2] sm:$0xff] }
   0x9   :  { %v230_v28 = vld [vmem:[%s356_s2] ss:$0 sm:$0xff] }
   0xb   :  { %236 = vmatpush3.bf16.msra.mxu0 %v259_v5 }
   0xc   :  { %237 = vmatprep.subr.bf16.mxu0 %v260_v6 }
   0xf   :  { %238 = vmatpush3.bf16.msra.mxu0 %v261_v7 }
  0x10   :  { %239 = vmatprep.subr.bf16.mxu0 %v262_v8 }
  0x13   :  { %240 = vmatpush3.bf16.msra.mxu0 %v263_v9 }
  0x14   :  { %241 = vmatprep.subr.bf16.mxu0 %v264_v10 }
  0x17   :  { %242 = vmatpush3.bf16.msra.mxu0 %v265_v13 }
  0x18   :  { %243 = vmatprep.subr.bf16.mxu0 %v266_v14 }
  0x1b   :  { %244 = vmatpush3.bf16.msra.mxu0 %v267_v15 }
  0x1c   :  { %245 = vmatprep.subr.bf16.mxu0 %v268_v16 }
  0x1f   :  { %246 = vmatpush3.bf16.msra.mxu0 %v269_v17 }
  0x22   :  { %187 = vmatmul.mubr.bf16.vlgmr.msra.gmra.mxu0 %v24_v19 }
  0xe2   :  { %v247_v21 = vpop.f32.mrf.mxu0 }
  0xe4   :  { %v248_v23 = vpop.f32.mrf.mxu0 }
  0xe5   :  { %v249_v24 = vadd.f32 %v248_v23, %v247_v21 }
  0xe6   :  { %v250_v25 = vpop.f32.mrf.mxu0 }
  0xe7   :  { %v194_v26 = vadd.f32 %v249_v24, %v21_v22 }
  0xe8   :  { %v251_v27 = vpop.f32.mrf.mxu0 }
  0xe9   :  { %196 = vst.msk [vmem:[#allocation2] sm:$0xff] %vm19_vm0, %v194_v26 }
  0xf0   :  { %v200_v29 = vld [vmem:[#allocation2] sm:$0xff] }
  0xf1   :  { %v208_v30 = vadd.f32 %v230_v28, %v200_v29 }
  0xf3   :  { %209 = vst.msk [vmem:[%s357_s3] sm:$0xff] %vm19_vm0, %v208_v30 }

// kernel: _lambda_.11
= control target key start
LH: loop header
LB: loop body
LE: loop exit
PB: predicated region body
PF: predicated region fallthrough
CT: control target
= control target key end

     0   :  { %v291_v0 = vmov 0.0   ;;  %vm292_vm0 = vmmov 0   ;;  %vm47_vm1 = vcmask 261120   ;;  %vm216_vm2 = vcmask 254976   ;;  %s373_s1 = inlined_call_operand.vmem [shape: bf16[32,128], index: 1, kind: input, shape index: {}]   ;;  %s374_s0 = inlined_call_operand.vmem [shape: f32[10,32], index: 0, kind: input, shape index: {}]   ;;  %s375_s3 = inlined_call_operand.vmem [shape: bf16[128,32], index: 3, kind: input, shape index: {}]   ;;  %s376_s2 = inlined_call_operand.vmem [shape: f32[1,128], index: 2, kind: input, shape index: {}]   ;;  %s377_s4 = inlined_call_operand.vmem [shape: f32[1,32], index: 4, kind: input, shape index: {}]   ;;  %s378_s5 = inlined_call_operand.vmem [shape: f32[10,32], index: 5, kind: output, shape index: {}]  }
   0x1   :  { %247 = vmatprep.subr.bf16.mxu0 %v291_v0  ;;  %v277_v1 = vld [vmem:[%s373_s1 + $0x8] sm:$0xff]   ;;  %251 = vmatprep.mubr.msk.bf16.mxu0 %vm292_vm0, %v291_v0  ;;  %v278_v2 = vld [vmem:[%s373_s1] sm:$0xff]   ;;  %v279_v5 = vld [vmem:[%s375_s3 + $0x38] sm:$0xff]  }
   0x2   :  { %255 = vmatprep.subr.bf16.mxu1 %v291_v0  ;;  %271 = vmatprep.mubr.msk.bf16.mxu1 %vm292_vm0, %v291_v0  ;;  %v21_v3 = vld [vmem:[%s374_s0] sm:$0xff]  ;;  %v22_v4 = vld [vmem:[%s374_s0 + $0x8] sm:$0x3]  ;;  %v280_v7 = vld [vmem:[%s375_s3 + $0x30] sm:$0xff]  }
   0x3   :  { %248 = vmatpush3.bf16.msra.mxu0 %v277_v1  ;;  %v23_v6 = vpack.c.bf16 %v22_v4, %v21_v3  ;;  %256 = vmatpush3.bf16.msra.mxu1 %v279_v5  ;;  %v281_v8 = vld [vmem:[%s375_s3 + $0x28] sm:$0xff]   ;;  %v282_v9 = vld [vmem:[%s375_s3 + $0x20] sm:$0xff]   ;;  %v283_v10 = vld [vmem:[%s375_s3 + $0x18] sm:$0xff]  }
   0x4   :  { %249 = vmatprep.subr.bf16.mxu0 %v291_v0  ;;  %257 = vmatprep.subr.bf16.mxu1 %v291_v0  ;;  %v284_v11 = vld [vmem:[%s375_s3 + $0x10] sm:$0xff]   ;;  %v285_v12 = vld [vmem:[%s375_s3 + $0x8] sm:$0xff]   ;;  %v286_v13 = vld [vmem:[%s375_s3] sm:$0xff]  }
   0x5   :  { %v222_v14 = vld [vmem:[%s376_s2] ss:$0 sm:$0xff] }
   0x6   :  { %v226_v32 = vld [vmem:[%s377_s4] ss:$0 sm:$0xff] }
   0x7   :  { %250 = vmatpush3.bf16.msra.mxu0 %v278_v2  ;;  %258 = vmatpush3.bf16.msra.mxu1 %v280_v7 }
   0x8   :  { %259 = vmatprep.subr.bf16.mxu1 %v291_v0 }
   0xa   :  { %252 = vmatmul.mubr.msk.bf16.vlgmr.msra.gmra.mxu0 %vm47_vm1, %v23_v6 }
   0xb   :  { %260 = vmatpush3.bf16.msra.mxu1 %v281_v8 }
   0xc   :  { %261 = vmatprep.subr.bf16.mxu1 %v291_v0 }
   0xf   :  { %262 = vmatpush3.bf16.msra.mxu1 %v282_v9 }
  0x10   :  { %263 = vmatprep.subr.bf16.mxu1 %v291_v0 }
  0x13   :  { %264 = vmatpush3.bf16.msra.mxu1 %v283_v10 }
  0x14   :  { %265 = vmatprep.subr.bf16.mxu1 %v291_v0 }
  0x17   :  { %266 = vmatpush3.bf16.msra.mxu1 %v284_v11 }
  0x18   :  { %267 = vmatprep.subr.bf16.mxu1 %v291_v0 }
  0x1b   :  { %268 = vmatpush3.bf16.msra.mxu1 %v285_v12 }
  0x1c   :  { %269 = vmatprep.subr.bf16.mxu1 %v291_v0 }
  0x1f   :  { %270 = vmatpush3.bf16.msra.mxu1 %v286_v13 }
  0xca   :  { %v85_v15 = vpop.f32.mrf.mxu0 }
  0xcb   :  { %v86_v16 = vadd.f32 %v222_v14, %v85_v15 }
  0xcc   :  { %v253_v17 = vpop.f32.mrf.mxu0 }
  0xcd   :  { %v94_v18 = vmul.f32 0.70710677, %v86_v16  ;;  %v92_v26 = vmul.f32 0.5, %v86_v16 }
  0xce   :  { %v88_v19 = vpop.f32.mrf.mxu0 }
  0xcf   :  { %287 = verf.f32 %v94_v18  ;;  %v89_v20 = vadd.f32 %v222_v14, %v88_v19 }
  0xd0   :  { %v254_v21 = vpop.f32.mrf.mxu0 }
  0xd1   :  { %v95_v22 = vmul.f32 0.70710677, %v89_v20  ;;  %v93_v27 = vmul.f32 0.5, %v89_v20 }
  0xd3   :  { %289 = verf.f32 %v95_v22 }
  0xdc   :  { %v288_v23 = vpop.eup %287 }
  0xdd   :  { %v98_v24 = vadd.f32 1.0, %v288_v23 }
  0xdf   :  { %v100_v29 = vmul.f32 %v98_v24, %v92_v26 }
  0xe0   :  { %v290_v25 = vpop.eup %289 }
  0xe1   :  { %v99_v28 = vadd.f32 1.0, %v290_v25 }
  0xe3   :  { %v101_v30 = vmul.f32 %v99_v28, %v93_v27 }
  0xe5   :  { %v102_v31 = vpack.c.bf16 %v101_v30, %v100_v29 }
  0xe7   :  { %272 = vmatmul.mubr.bf16.vlgmr.msra.gmra.mxu1 %v102_v31 }
 0x1a7   :  { %v208_v33 = vpop.f32.mrf.mxu1 }
 0x1a8   :  { %v209_v34 = vadd.f32 %v226_v32, %v208_v33 }
 0x1a9   :  { %v273_v35 = vpop.f32.mrf.mxu1 }
 0x1aa   :  { %215 = vst.msk [vmem:[%s378_s5] sm:$0xff] %vm47_vm1, %v209_v34 }
 0x1ab   :  { %v211_v36 = vpop.f32.mrf.mxu1 }
 0x1ac   :  { %v212_v37 = vadd.f32 %v226_v32, %v211_v36 }
 0x1ad   :  { %v274_v38 = vpop.f32.mrf.mxu1 }
 0x1ae   :  { %217 = vst.msk [vmem:[%s378_s5 + $0x8] sm:$0x3] %vm216_vm2, %v212_v37 }

// kernel: _lambda_.10
= control target key start
LH: loop header
LB: loop body
LE: loop exit
PB: predicated region body
PF: predicated region fallthrough
CT: control target
= control target key end

     0   :  { %s1180_s24 = smov 0   ;;  %s1301_s0 = inlined_call_operand.vmem [shape: f32[2,5,96], index: 0, kind: input, shape index: {}]   ;;  %s1302_s1 = inlined_call_operand.vmem [shape: f32[2,5,32], index: 1, kind: input, shape index: {}]   ;;  %s1303_s2 = inlined_call_operand.vmem [shape: bf16[32,32], index: 2, kind: input, shape index: {}]   ;;  %s1304_s3 = inlined_call_operand.vmem [shape: f32[1,32], index: 3, kind: input, shape index: {}]   ;;  %s1305_s4 = inlined_call_operand.vmem [shape: f32[1,32], index: 4, kind: input, shape index: {}]   ;;  %s1306_s5 = inlined_call_operand.vmem [shape: f32[1,32], index: 5, kind: input, shape index: {}]   ;;  %s1307_s6 = inlined_call_operand.vmem [shape: f32[2,5,32], index: 6, kind: output, shape index: {0}]   ;;  %s1308_s7 = inlined_call_operand.vmem [shape: f32[2,5,32], index: 7, kind: output, shape index: {1}]  }
   0x1 LB: > { %s970_s25 = sadd.s32 4294967295, %s1121_s24   ;;  %p974_p0 = scmp.ge.s32.totalorder %s1121_s24, 1  ;;  %s1121_s24 = sphi %s1180_s24, %s18_s24  }
   0x2   : > { %p248_p1 = scmp.lt.s32.totalorder %s1121_s24, 3 }
   0x4   : > { %p249_p2 = pnand %p974_p0, %p248_p1 }
   0x5   : > { %p286_p3 = scmp.lt.s32.totalorder (!%p249_p2), %s970_s25, 1  ;;  %s1125_s30 = smov (!%p249_p2), 96  }
   0x6   : > { %252 = sbr.rel (%p249_p2) target bundleno = 1687 (0x697), region = 44  ;;  %s1126_s8 = smov (!%p249_p2), 64  }
   0x7   : > { %s1127_s9 = smov (!%p249_p2), 88   ;;  %s1128_s10 = smov (!%p249_p2), 120  }
   0x8   : > { %s1129_s11 = smov (!%p249_p2), 80   ;;  %s1130_s12 = smov (!%p249_p2), 112  }
   0x9   : > { %s1131_s13 = smov (!%p249_p2), 72   ;;  %s1132_s14 = smov (!%p249_p2), 104  }
   0xa   : > { %s1134_s15 = smov (!%p249_p2), 56   ;;  %s1135_s16 = smov (!%p249_p2), 48  }
   0xb   : > { %v1123_v0 = vmov 0.0   ;;  %vm1124_vm0 = vmmov 0   ;;  %s1310_s25 = smov (!%p286_p3, %s970_s25), 1  ;;  %vm310_vm1 = vcmask 64512   ;;  %vm357_vm2 = vcmask 36864   ;;  %s1136_s17 = smov 40  }
   0xc   : > { %1014 = vmatprep.subr.bf16.mxu0 %v1123_v0  ;;  %1016 = vmatprep.mubr.msk.bf16.mxu0 %vm1124_vm0, %v1123_v0  ;;  %s1194_s26 = sshll.u32 %s1310_s25, 3  ;;  %vm374_vm3 = vcmask 1041408   ;;  %vm375_vm4 = vcmask 1042432   ;;  %v1133_v13 = vmov 65535   ;;  %vm370_vm5 = vcmask 39936   ;;  %s1137_s22 = smov 8  }
   0xd   : > { %1020 = vmatprep.subr.bf16.mxu1 %v1123_v0  ;;  %1022 = vmatprep.mubr.msk.bf16.mxu1 %vm1124_vm0, %v1123_v0  ;;  %s289_s29 = scalar_lea.vmem %s1301_s0, %s1194_s26  ;;  %v376_v14 = vsel %vm374_vm3, 4294967295, %v1133_v13  ;;  %s1138_s23 = smov 16   ;;  %vm767_vm6 = vcmask 130048   ;;  %vm769_vm7 = vcmask 195584   ;;  %vm795_vm8 = vcmask 261120  }
   0xe   : > { %v303_v1 = vld [vmem:[%s289_s29] sm:$0x1f]  ;;  %v1213_v15 = vsel %vm375_vm4, %v376_v14, 0  ;;  %v1095_v14 = vld [vmem:[%s1303_s2 + $0x8] sm:$0xff]   ;;  %s1139_s25 = smov 24   ;;  %s293_s29 = scalar_lea.vmem %s1302_s1, %s1194_s26  ;;  %vm841_vm9 = vcmask 258048  }
   0xf   : > { %v1200_v2 = vpack.c.bf16 %v303_v1, %v303_v1  ;;  %v304_v5 = vmul.f32 0.35355338, %v303_v1  ;;  %s297_s18 = scalar_lea.vmem %s1307_s6, %s1194_s26 }
  0x11   : > { %308 = vrot.lane.b32.xlu0 %v1200_v2, %s1125_s30  ;;  %v305_v6 = vpack.c.bf16 %v304_v5, %v304_v5  ;;  %368 = vrot.lane.b32.xlu1 %v1200_v2, %s1126_s8 }
  0x15   : > { %426 = vrot.lane.b32.xlu1 %v1200_v2, %s1127_s9 }
  0x19   : > { %424 = vrot.lane.b32.xlu1 %v305_v6, %s1128_s10 }
  0x1d   : > { %536 = vrot.lane.b32.xlu1 %v1200_v2, %s1129_s11  ;;  %s301_s11 = scalar_lea.vmem %s1308_s7, %s1194_s26 }
  0x21   : > { %534 = vrot.lane.b32.xlu1 %v305_v6, %s1130_s12 }
  0x25   : > { %646 = vrot.lane.b32.xlu1 %v1200_v2, %s1131_s13 }
  0x29   : > { %644 = vrot.lane.b32.xlu1 %v305_v6, %s1132_s14 }
  0x83   : > { %v309_v3 = vpop.permute.xlu0 %308  ;;  %v369_v12 = vpop.permute.xlu1 %368 }
  0x84   : > { %v315_v4 = vsel %vm310_vm1, %v309_v3, 0  ;;  %v379_v16 = vand.u32 %v1213_v15, %v369_v12 }
  0x85   : > { %1015 = vmatpush3.bf16.xpose.msra.mxu0 %v315_v4 }
  0x86   : > { %1032 = vmatprep.subr.bf16.mxu0 %v1123_v0  ;;  %1021 = vmatpush3.bf16.msra.mxu1 %v379_v16 }
  0x87   : > { %1026 = vmatprep.subr.bf16.mxu1 %v1123_v0  ;;  %v427_v20 = vpop.permute.xlu1 %426 }
  0x88   : > { %v432_v23 = vsel %vm310_vm1, %v427_v20, 0 }
  0x8b   : > { %v425_v21 = vpop.permute.xlu1 %424 }
  0x8c   : > { %1017 = vmatmul.mubr.msk.bf16.vlgmr.msra.gmra.mxu0 %vm310_vm1, %v305_v6 }
  0x8d   : > { %1034 = vmatprep.mubr.msk.bf16.mxu0 %vm1124_vm0, %v1123_v0 }
  0x8f   : > { %v537_v25 = vpop.permute.xlu1 %536 }
  0x90   : > { %v542_v27 = vsel %vm310_vm1, %v537_v25, 0 }
  0x93   : > { %v535_v26 = vpop.permute.xlu1 %534 }
  0x97   : > { %v647_v28 = vpop.permute.xlu1 %646 }
  0x98   : > { %v652_v29 = vsel %vm310_vm1, %v647_v28, 0 }
  0x9b   : > { %v645_v30 = vpop.permute.xlu1 %644 }
 0x14c   : > { %v351_v7 = vpop.f32.mrf.mxu0 }
 0x14d   : > { %v358_v8 = vsel %vm357_vm2, %v351_v7, -inf }
 0x14e   : > { %359 = vmax.xlane.f32.xlu0 %v358_v8  ;;  %v1018_v9 = vpop.f32.mrf.mxu0 }
 0x150   : > { %v354_v10 = vpop.f32.mrf.mxu0 }
 0x152   : > { %v1019_v11 = vpop.f32.mrf.mxu0 }
 0x164   : > { %484 = vrot.lane.b32.xlu0 %v1200_v2, %s1134_s15 }
 0x1d7   : > { %v360_v17 = vpop.xlane.xlu0 %359 }
 0x1d8   : > { %v361_v18 = vsub.f32 %v351_v7, %v360_v17 }
 0x1da   : > { %v362_v19 = vmul.f32 1.442695, %v361_v18  ;;  %v1096_v18 = vld [vmem:[%s1303_s2] sm:$0xff]  }
 0x1db   : > { %v485_v31 = vpop.permute.xlu0 %484 }
 0x1dc   : > { %1097 = vpow2.f32 %v362_v19  ;;  %v490_v32 = vand.u32 %v485_v31, %v1213_v15 }
 0x1de   : > { %1033 = vmatpush3.bf16.msra.mxu0 %v490_v32 }
 0x1df   : > { %1044 = vmatprep.subr.bf16.mxu0 %v1123_v0 }
 0x1e9   : > { %v1218_v22 = vpop.eup %1097 }
 0x1ea   : > { %v367_v24 = vpack.c.bf16 %v1218_v22, %v1218_v22  ;;  %v364_v11 = vsel %vm357_vm2, %v1218_v22, 0.0 }
 0x1ec   : > { %1023 = vmatmul.mubr.msk.bf16.vlgmr.msra.gmra.mxu1 %vm370_vm5, %v367_v24 }
 0x1ed   : > { %1027 = vmatpush3.bf16.xpose.msra.mxu1 %v432_v23  ;;  %1028 = vmatprep.mubr.msk.bf16.mxu1 %vm1124_vm0, %v1123_v0 }
 0x1ee   : > { %1038 = vmatprep.subr.bf16.mxu1 %v1123_v0 }
 0x1f4   : > { %1029 = vmatmul.mubr.msk.bf16.vlgmr.msra.gmra.mxu1 %vm310_vm1, %v425_v21 }
 0x1f5   : > { %1039 = vmatpush3.bf16.xpose.msra.mxu1 %v542_v27  ;;  %1040 = vmatprep.mubr.msk.bf16.mxu1 %vm1124_vm0, %v1123_v0 }
 0x1f6   : > { %1050 = vmatprep.subr.bf16.mxu1 %v1123_v0 }
 0x1fc   : > { %1041 = vmatmul.mubr.msk.bf16.vlgmr.msra.gmra.mxu1 %vm310_vm1, %v535_v26 }
 0x1fd   : > { %1051 = vmatpush3.bf16.xpose.msra.mxu1 %v652_v29  ;;  %1052 = vmatprep.mubr.msk.bf16.mxu1 %vm1124_vm0, %v1123_v0 }
 0x1fe   : > { %1062 = vmatprep.subr.bf16.mxu1 %v1123_v0 }
 0x204   : > { %1053 = vmatmul.mubr.msk.bf16.vlgmr.msra.gmra.mxu1 %vm310_vm1, %v645_v30 }
 0x205   : > { %1066 = vmatprep.mubr.msk.bf16.mxu1 %vm1124_vm0, %v1123_v0  ;;  %1063 = vmatpush3.bf16.msra.mxu1 %v1095_v14 }
 0x206   : > { %1064 = vmatprep.subr.bf16.mxu1 %v1123_v0 }
 0x209   : > { %1065 = vmatpush3.bf16.msra.mxu1 %v1096_v18 }
 0x2ac   : > { %v1242_v33 = vpop.f32.mrf.mxu1 }
 0x2ae   : > { %v1024_v34 = vpop.f32.mrf.mxu1 }
 0x2b0   : > { %v418_v35 = vpop.f32.mrf.mxu1 }
 0x2b2   : > { %v1025_v36 = vpop.f32.mrf.mxu1 }
 0x2b4   : > { %v468_v37 = vpop.f32.mrf.mxu1 }
 0x2b5   : > { %v474_v38 = vsel %vm357_vm2, %v468_v37, -inf }
 0x2b6   : > { %475 = vmax.xlane.f32.xlu1 %v474_v38  ;;  %v1030_v39 = vpop.f32.mrf.mxu1 }
 0x2b8   : > { %v471_v40 = vpop.f32.mrf.mxu1 }
 0x2ba   : > { %v1031_v41 = vpop.f32.mrf.mxu1 }
 0x2bc   : > { %v578_v42 = vpop.f32.mrf.mxu1 }
 0x2bd   : > { %v584_v43 = vsel %vm357_vm2, %v578_v42, -inf }
 0x2be   : > { %585 = vmax.xlane.f32.xlu0 %v584_v43  ;;  %v1042_v44 = vpop.f32.mrf.mxu1 }
 0x2c0   : > { %v581_v45 = vpop.f32.mrf.mxu1 }
 0x2c2   : > { %v1043_v46 = vpop.f32.mrf.mxu1 }
 0x2c3   : > { %v839_v46 = vld [vmem:[%s293_s29] sm:$0x1f] }
 0x2c4   : > { %v688_v47 = vpop.f32.mrf.mxu1 }
 0x2c5   : > { %v694_v48 = vsel %vm357_vm2, %v688_v47, -inf }
 0x2c6   : > { %695 = vmax.xlane.f32.xlu0 %v694_v48  ;;  %v1054_v49 = vpop.f32.mrf.mxu1 }
 0x2c7   : > { %594 = vrot.lane.b32.xlu1 %v1200_v2, %s1135_s16 }
 0x2c8   : > { %v691_v50 = vpop.f32.mrf.mxu1 }
 0x2ca   : > { %v1055_v51 = vpop.f32.mrf.mxu1 }
 0x2dc   : > { %704 = vrot.lane.b32.xlu0 %v1200_v2, %s1136_s17 }
 0x33f   : > { %v476_v52 = vpop.xlane.xlu1 %475 }
 0x340   : > { %v477_v53 = vsub.f32 %v468_v37, %v476_v52 }
 0x342   : > { %v478_v54 = vmul.f32 1.442695, %v477_v53 }
 0x343   : > { %v595_v58 = vpop.permute.xlu1 %594 }
 0x344   : > { %1099 = vpow2.f32 %v478_v54  ;;  %v600_v62 = vand.u32 %v595_v58, %v1213_v15 }
 0x347   : > { %v586_v55 = vpop.xlane.xlu0 %585 }
 0x348   : > { %v587_v56 = vsub.f32 %v578_v42, %v586_v55 }
 0x34a   : > { %v588_v57 = vmul.f32 1.442695, %v587_v56 }
 0x34c   : > { %1101 = vpow2.f32 %v588_v57 }
 0x34f   : > { %v696_v59 = vpop.xlane.xlu0 %695 }
 0x350   : > { %v697_v60 = vsub.f32 %v688_v47, %v696_v59 }
 0x351   : > { %v1100_v61 = vpop.eup %1099 }
 0x352   : > { %v698_v63 = vmul.f32 1.442695, %v697_v60  ;;  %v480_v1 = vsel %vm357_vm2, %v1100_v61, 0.0  ;;  %v483_v3 = vpack.c.bf16 %v1100_v61, %v1100_v61 }
 0x353   : > { %481 = vadd.xlane.f32.xlu0 %v480_v1  ;;  %v705_v2 = vpop.permute.xlu0 %704  ;;  %v992_v1 = vld [vmem:[%s1306_s5] ss:$0 sm:$0xff] }
 0x354   : > { %1103 = vpow2.f32 %v698_v63  ;;  %1035 = vmatmul.mubr.msk.bf16.vlgmr.msra.gmra.mxu0 %vm370_vm5, %v483_v3  ;;  %v710_v5 = vand.u32 %v705_v2, %v1213_v15 }
 0x355   : > { %1045 = vmatpush3.bf16.msra.mxu0 %v600_v62  ;;  %1046 = vmatprep.mubr.msk.bf16.mxu0 %vm1124_vm0, %v1123_v0  ;;  %v991_v62 = vld [vmem:[%s1305_s4] ss:$0 sm:$0xff] }
 0x356   : > { %1056 = vmatprep.subr.bf16.mxu0 %v1123_v0 }
 0x359   : > { %v1102_v4 = vpop.eup %1101 }
 0x35a   : > { %v590_v6 = vsel %vm357_vm2, %v1102_v4, 0.0  ;;  %v593_v7 = vpack.c.bf16 %v1102_v4, %v1102_v4 }
 0x35b   : > { %591 = vadd.xlane.f32.xlu1 %v590_v6 }
 0x35c   : > { %1047 = vmatmul.mubr.msk.bf16.vlgmr.msra.gmra.mxu0 %vm370_vm5, %v593_v7 }
 0x35d   : > { %1057 = vmatpush3.bf16.msra.mxu0 %v710_v5  ;;  %1058 = vmatprep.mubr.msk.bf16.mxu0 %vm1124_vm0, %v1123_v0 }
 0x361   : > { %v1104_v8 = vpop.eup %1103 }
 0x362   : > { %v700_v9 = vsel %vm357_vm2, %v1104_v8, 0.0  ;;  %v703_v10 = vpack.c.bf16 %v1104_v8, %v1104_v8 }
 0x363   : > { %701 = vadd.xlane.f32.xlu0 %v700_v9 }
 0x364   : > { %1059 = vmatmul.mubr.msk.bf16.vlgmr.msra.gmra.mxu0 %vm370_vm5, %v703_v10 }
 0x367   : > { %365 = vadd.xlane.f32.xlu0 %v364_v11 }
 0x3dc   : > { %v482_v12 = vpop.xlane.xlu0 %481 }
 0x3dd   : > { %1105 = vrcp.f32 %v482_v12 }
 0x3e4   : > { %v592_v13 = vpop.xlane.xlu1 %591 }
 0x3e5   : > { %1107 = vrcp.f32 %v592_v13 }
 0x3ea   : > { %v1106_v15 = vpop.eup %1105 }
 0x3ec   : > { %v702_v16 = vpop.xlane.xlu0 %701 }
 0x3ed   : > { %1109 = vrcp.f32 %v702_v16 }
 0x3f0   : > { %v366_v35 = vpop.xlane.xlu0 %365 }
 0x3f1   : > { %1111 = vrcp.f32 %v366_v35 }
 0x3f2   : > { %v1108_v23 = vpop.eup %1107 }
 0x3fa   : > { %v1110_v29 = vpop.eup %1109 }
 0x3fe   : > { %v1112_v36 = vpop.eup %1111 }
 0x3ff   : > { %v422_v38 = vmul.f32 %v1112_v36, %v1242_v33  ;;  %v987_v33 = vld [vmem:[%s1304_s3] ss:$0 sm:$0xff] }
 0x414   : > { %v526_v17 = vpop.f32.mrf.mxu0 }
 0x415   : > { %v533_v19 = vmul.f32 %v1106_v15, %v526_v17 }
 0x416   : > { %v1036_v20 = vpop.f32.mrf.mxu0 }
 0x417   : > { %755 = vrot.lane.b32.xlu0 %v533_v19, %s1137_s22 }
 0x418   : > { %v529_v21 = vpop.f32.mrf.mxu0 }
 0x41a   : > { %v1037_v22 = vpop.f32.mrf.mxu0 }
 0x41c   : > { %v636_v24 = vpop.f32.mrf.mxu0 }
 0x41d   : > { %v643_v25 = vmul.f32 %v1108_v23, %v636_v24 }
 0x41e   : > { %v1048_v26 = vpop.f32.mrf.mxu0 }
 0x41f   : > { %759 = vrot.lane.b32.xlu1 %v643_v25, %s1138_s23 }
 0x420   : > { %v639_v27 = vpop.f32.mrf.mxu0 }
 0x422   : > { %v1049_v28 = vpop.f32.mrf.mxu0 }
 0x424   : > { %v746_v30 = vpop.f32.mrf.mxu0 }
 0x425   : > { %v753_v31 = vmul.f32 %v1110_v29, %v746_v30 }
 0x426   : > { %v1060_v32 = vpop.f32.mrf.mxu0 }
 0x427   : > { %763 = vrot.lane.b32.xlu0 %v753_v31, %s1139_s25 }
 0x428   : > { %v749_v0 = vpop.f32.mrf.mxu0 }
 0x42a   : > { %v1061_v34 = vpop.f32.mrf.mxu0 }
 0x489   : > { %v756_v37 = vpop.permute.xlu0 %755 }
 0x48a   : > { %v766_v40 = vsel %vm310_vm1, %v422_v38, %v756_v37 }
 0x491   : > { %v760_v39 = vpop.permute.xlu1 %759 }
 0x492   : > { %v768_v41 = vsel %vm767_vm6, %v766_v40, %v760_v39 }
 0x499   : > { %v764_v42 = vpop.permute.xlu0 %763 }
 0x49a   : > { %v770_v43 = vsel %vm769_vm7, %v768_v41, %v764_v42 }
 0x49b   : > { %v771_v44 = vpack.c.bf16 %v770_v43, %v770_v43 }
 0x49d   : > { %1067 = vmatmul.mubr.msk.bf16.vlgmr.msra.gmra.mxu1 %vm795_vm8, %v771_v44 }
 0x55d   : > { %v833_v45 = vpop.f32.mrf.mxu1 }
 0x55e   : > { %v834_v47 = vadd.f32 %v987_v33, %v833_v45 }
 0x55f   : > { %v1068_v48 = vpop.f32.mrf.mxu1 }
 0x560   : > { %v840_v49 = vadd.f32 %v839_v46, %v834_v47 }
 0x561   : > { %v836_v50 = vpop.f32.mrf.mxu1 }
 0x562   : > { %v845_v51 = vsel %vm841_vm9, %v840_v49, 0.0  ;;  %842 = vst.msk [vmem:[%s301_s11] sm:$0x1f] %vm841_vm9, %v840_v49 }
 0x563   : > { %846 = vadd.xlane.f32.xlu0 %v845_v51  ;;  %v1069_v52 = vpop.f32.mrf.mxu1 }
 0x5ec   : > { %v847_v53 = vpop.xlane.xlu0 %846 }
 0x5ed   : > { %v849_v54 = vmul.f32 0.03125, %v847_v53 }
 0x5ef   : > { %v850_v55 = vsub.f32 %v840_v49, %v849_v54 }
 0x5f1   : > { %v851_v56 = vmul.f32 %v850_v55, %v850_v55 }
 0x5f3   : > { %v852_v57 = vsel %vm841_vm9, %v851_v56, 0.0 }
 0x5f4   : > { %853 = vadd.xlane.f32.xlu1 %v852_v57 }
 0x67d   : > { %v854_v58 = vpop.xlane.xlu1 %853 }
 0x67e   : > { %v855_v59 = vmul.f32 0.03125, %v854_v58 }
 0x680   : > { %v856_v60 = vadd.f32 1e-06, %v855_v59 }
 0x682   : > { %1113 = vrsqrt.f32 %v856_v60 }
 0x68f   : > { %v1114_v61 = vpop.eup %1113 }
 0x690   : > { %v858_v63 = vmul.f32 %v1114_v61, %v850_v55 }
 0x692   : > { %v865_v3 = vmul.f32 %v991_v62, %v858_v63 }
 0x694   : > { %v872_v2 = vadd.f32 %v992_v1, %v865_v3 }
 0x696   : > { %873 = vst.msk [vmem:[%s297_s18] sm:$0x1f] %vm841_vm9, %v872_v2 }
 0x697 PF: > { %s18_s24 = sadd.s32 1, %s1121_s24  }
 0x698   : > { %p15_p4 = scmp.ge.s32.totalorder %s18_s24, 4  }
 0x69a   :  { %17 = sbr.rel (!%p15_p4) target bundleno = 1 (0x1), region = 89 }

// kernel: _lambda_.14
= control target key start
LH: loop header
LB: loop body
LE: loop exit
PB: predicated region body
PF: predicated region fallthrough
CT: control target
= control target key end

     0   :  { %v280_v0 = vmov 0.0   ;;  %vm281_vm0 = vmmov 0   ;;  %vm46_vm1 = vcmask 261120   ;;  %vm207_vm2 = vcmask 254976   ;;  %s354_s1 = inlined_call_operand.vmem [shape: bf16[32,128], index: 1, kind: input, shape index: {}]   ;;  %s355_s0 = inlined_call_operand.vmem [shape: f32[2,32], index: 0, kind: input, shape index: {}]   ;;  %s356_s3 = inlined_call_operand.vmem [shape: bf16[128,32], index: 3, kind: input, shape index: {}]   ;;  %s357_s2 = inlined_call_operand.vmem [shape: f32[1,128], index: 2, kind: input, shape index: {}]   ;;  %s358_s4 = inlined_call_operand.vmem [shape: f32[1,32], index: 4, kind: input, shape index: {}]   ;;  %s359_s5 = inlined_call_operand.vmem [shape: f32[2,32], index: 5, kind: output, shape index: {}]  }
   0x1   :  { %238 = vmatprep.subr.bf16.mxu0 %v280_v0  ;;  %v268_v1 = vld [vmem:[%s354_s1 + $0x8] sm:$0xff]   ;;  %242 = vmatprep.mubr.msk.bf16.mxu0 %vm281_vm0, %v280_v0  ;;  %v269_v2 = vld [vmem:[%s354_s1] sm:$0xff]   ;;  %v270_v4 = vld [vmem:[%s356_s3 + $0x38] sm:$0xff]  }
   0x2   :  { %246 = vmatprep.subr.bf16.mxu1 %v280_v0  ;;  %262 = vmatprep.mubr.msk.bf16.mxu1 %vm281_vm0, %v280_v0  ;;  %v21_v3 = vld [vmem:[%s355_s0] sm:$0x3]  ;;  %v271_v5 = vld [vmem:[%s356_s3 + $0x30] sm:$0xff]   ;;  %v272_v7 = vld [vmem:[%s356_s3 + $0x28] sm:$0xff]  }
   0x3   :  { %239 = vmatpush3.bf16.msra.mxu0 %v268_v1  ;;  %v22_v6 = vpack.c.bf16 %v21_v3, %v21_v3  ;;  %247 = vmatpush3.bf16.msra.mxu1 %v270_v4  ;;  %v273_v8 = vld [vmem:[%s356_s3 + $0x20] sm:$0xff]   ;;  %v274_v9 = vld [vmem:[%s356_s3 + $0x18] sm:$0xff]   ;;  %v275_v10 = vld [vmem:[%s356_s3 + $0x10] sm:$0xff]  }
   0x4   :  { %240 = vmatprep.subr.bf16.mxu0 %v280_v0  ;;  %248 = vmatprep.subr.bf16.mxu1 %v280_v0  ;;  %v276_v11 = vld [vmem:[%s356_s3 + $0x8] sm:$0xff]   ;;  %v277_v12 = vld [vmem:[%s356_s3] sm:$0xff]  }
   0x5   :  { %v213_v13 = vld [vmem:[%s357_s2] ss:$0 sm:$0xff] }
   0x6   :  { %v217_v25 = vld [vmem:[%s358_s4] ss:$0 sm:$0xff] }
   0x7   :  { %241 = vmatpush3.bf16.msra.mxu0 %v269_v2  ;;  %249 = vmatpush3.bf16.msra.mxu1 %v271_v5 }
   0x8   :  { %250 = vmatprep.subr.bf16.mxu1 %v280_v0 }
   0xa   :  { %243 = vmatmul.mubr.msk.bf16.vlgmr.msra.gmra.mxu0 %vm46_vm1, %v22_v6 }
   0xb   :  { %251 = vmatpush3.bf16.msra.mxu1 %v272_v7 }
   0xc   :  { %252 = vmatprep.subr.bf16.mxu1 %v280_v0 }
   0xf   :  { %253 = vmatpush3.bf16.msra.mxu1 %v273_v8 }
  0x10   :  { %254 = vmatprep.subr.bf16.mxu1 %v280_v0 }
  0x13   :  { %255 = vmatpush3.bf16.msra.mxu1 %v274_v9 }
  0x14   :  { %256 = vmatprep.subr.bf16.mxu1 %v280_v0 }
  0x17   :  { %257 = vmatpush3.bf16.msra.mxu1 %v275_v10 }
  0x18   :  { %258 = vmatprep.subr.bf16.mxu1 %v280_v0 }
  0x1b   :  { %259 = vmatpush3.bf16.msra.mxu1 %v276_v11 }
  0x1c   :  { %260 = vmatprep.subr.bf16.mxu1 %v280_v0 }
  0x1f   :  { %261 = vmatpush3.bf16.msra.mxu1 %v277_v12 }
  0xca   :  { %v84_v14 = vpop.f32.mrf.mxu0 }
  0xcb   :  { %v85_v15 = vadd.f32 %v213_v13, %v84_v14 }
  0xcc   :  { %v244_v16 = vpop.f32.mrf.mxu0 }
  0xcd   :  { %v91_v17 = vmul.f32 0.70710677, %v85_v15  ;;  %v90_v21 = vmul.f32 0.5, %v85_v15 }
  0xce   :  { %v87_v18 = vpop.f32.mrf.mxu0 }
  0xcf   :  { %278 = verf.f32 %v91_v17 }
  0xd0   :  { %v245_v19 = vpop.f32.mrf.mxu0 }
  0xdc   :  { %v279_v20 = vpop.eup %278 }
  0xdd   :  { %v93_v22 = vadd.f32 1.0, %v279_v20 }
  0xdf   :  { %v94_v23 = vmul.f32 %v93_v22, %v90_v21 }
  0xe1   :  { %v95_v24 = vpack.c.bf16 %v94_v23, %v94_v23 }
  0xe3   :  { %263 = vmatmul.mubr.bf16.vlgmr.msra.gmra.mxu1 %v95_v24 }
 0x1a3   :  { %v201_v26 = vpop.f32.mrf.mxu1 }
 0x1a4   :  { %v202_v27 = vadd.f32 %v217_v25, %v201_v26 }
 0x1a5   :  { %v264_v28 = vpop.f32.mrf.mxu1 }
 0x1a6   :  { %208 = vst.msk [vmem:[%s359_s5] sm:$0x3] %vm207_vm2, %v202_v27 }
 0x1a7   :  { %v204_v29 = vpop.f32.mrf.mxu1 }
 0x1a9   :  { %v265_v30 = vpop.f32.mrf.mxu1 }

// kernel: _lambda_.13
= control target key start
LH: loop header
LB: loop body
LE: loop exit
PB: predicated region body
PF: predicated region fallthrough
CT: control target
= control target key end

     0   :  { %s1141_s24 = smov 0   ;;  %s1265_s0 = inlined_call_operand.vmem [shape: f32[2,5,96], index: 0, kind: input, shape index: {}]   ;;  %s1266_s1 = inlined_call_operand.vmem [shape: f32[2,5,32], index: 1, kind: input, shape index: {}]   ;;  %s1267_s2 = inlined_call_operand.vmem [shape: bf16[32,32], index: 2, kind: input, shape index: {}]   ;;  %s1268_s3 = inlined_call_operand.vmem [shape: f32[1,32], index: 3, kind: input, shape index: {}]   ;;  %s1269_s4 = inlined_call_operand.vmem [shape: f32[1,32], index: 4, kind: input, shape index: {}]   ;;  %s1270_s5 = inlined_call_operand.vmem [shape: f32[1,32], index: 5, kind: input, shape index: {}]   ;;  %s1271_s6 = inlined_call_operand.vmem [shape: f32[2,1,32], index: 6, kind: output, shape index: {0}]   ;;  %s1272_s7 = inlined_call_operand.vmem [shape: f32[2,1,32], index: 7, kind: output, shape index: {1}]  }
   0x1 LB: > { %s936_s25 = sadd.s32 4294967295, %s1082_s24   ;;  %p940_p0 = scmp.ge.s32.totalorder %s1082_s24, 1  ;;  %s1082_s24 = sphi %s1141_s24, %s18_s24  }
   0x2   : > { %p248_p1 = scmp.lt.s32.totalorder %s1082_s24, 3 }
   0x4   : > { %p249_p2 = pnand %p940_p0, %p248_p1 }
   0x5   : > { %p284_p3 = scmp.lt.s32.totalorder (!%p249_p2), %s936_s25, 1  ;;  %s1086_s30 = smov (!%p249_p2), 96  }
   0x6   : > { %252 = sbr.rel (%p249_p2) target bundleno = 1687 (0x697), region = 44  ;;  %s1087_s8 = smov (!%p249_p2), 64  }
   0x7   : > { %s1088_s9 = smov (!%p249_p2), 88   ;;  %s1089_s10 = smov (!%p249_p2), 120  }
   0x8   : > { %s1090_s11 = smov (!%p249_p2), 80   ;;  %s1091_s12 = smov (!%p249_p2), 112  }
   0x9   : > { %s1092_s13 = smov (!%p249_p2), 72   ;;  %s1093_s14 = smov (!%p249_p2), 104  }
   0xa   : > { %s1095_s15 = smov (!%p249_p2), 56   ;;  %s1096_s16 = smov (!%p249_p2), 48  }
   0xb   : > { %v1084_v0 = vmov 0.0   ;;  %vm1085_vm0 = vmmov 0   ;;  %s1274_s25 = smov (!%p284_p3, %s936_s25), 1  ;;  %vm306_vm1 = vcmask 64512   ;;  %vm353_vm2 = vcmask 32768   ;;  %s1097_s17 = smov 40  }
   0xc   : > { %975 = vmatprep.subr.bf16.mxu0 %v1084_v0  ;;  %977 = vmatprep.mubr.msk.bf16.mxu0 %vm1085_vm0, %v1084_v0  ;;  %s941_s26 = sshll.u32 %s1274_s25, 3  ;;  %vm370_vm3 = vcmask 1041408   ;;  %vm371_vm4 = vcmask 1042432   ;;  %v1094_v13 = vmov 65535   ;;  %vm366_vm5 = vcmask 39936   ;;  %s1098_s22 = smov 8  }
   0xd   : > { %981 = vmatprep.subr.bf16.mxu1 %v1084_v0  ;;  %983 = vmatprep.mubr.msk.bf16.mxu1 %vm1085_vm0, %v1084_v0  ;;  %s287_s29 = scalar_lea.vmem %s1265_s0, %s941_s26  ;;  %v372_v14 = vsel %vm370_vm3, 4294967295, %v1094_v13  ;;  %s1099_s23 = smov 16   ;;  %vm763_vm6 = vcmask 130048   ;;  %vm765_vm7 = vcmask 195584   ;;  %vm785_vm8 = vcmask 261120  }
   0xe   : > { %v299_v1 = vld [vmem:[%s287_s29] sm:$0x1f]  ;;  %v1176_v15 = vsel %vm371_vm4, %v372_v14, 0  ;;  %v1056_v14 = vld [vmem:[%s1267_s2 + $0x8] sm:$0xff]   ;;  %s1100_s27 = smov 24   ;;  %vm831_vm9 = vcmask 253952   ;;  %s294_s18 = scalar_lea.vmem %s1271_s6, %s1274_s25 }
   0xf   : > { %v1163_v2 = vpack.c.bf16 %v299_v1, %v299_v1  ;;  %v300_v5 = vmul.f32 0.35355338, %v299_v1 }
  0x11   : > { %304 = vrot.lane.b32.xlu0 %v1163_v2, %s1086_s30  ;;  %v301_v6 = vpack.c.bf16 %v300_v5, %v300_v5  ;;  %364 = vrot.lane.b32.xlu1 %v1163_v2, %s1087_s8  ;;  %s291_s30 = scalar_lea.vmem %s1266_s1, %s941_s26 }
  0x15   : > { %422 = vrot.lane.b32.xlu1 %v1163_v2, %s1088_s9 }
  0x19   : > { %420 = vrot.lane.b32.xlu1 %v301_v6, %s1089_s10 }
  0x1d   : > { %532 = vrot.lane.b32.xlu1 %v1163_v2, %s1090_s11 }
  0x21   : > { %530 = vrot.lane.b32.xlu1 %v301_v6, %s1091_s12  ;;  %s297_s12 = scalar_lea.vmem %s1272_s7, %s1274_s25 }
  0x25   : > { %642 = vrot.lane.b32.xlu1 %v1163_v2, %s1092_s13 }
  0x29   : > { %640 = vrot.lane.b32.xlu1 %v301_v6, %s1093_s14 }
  0x83   : > { %v305_v3 = vpop.permute.xlu0 %304  ;;  %v365_v12 = vpop.permute.xlu1 %364 }
  0x84   : > { %v311_v4 = vsel %vm306_vm1, %v305_v3, 0  ;;  %v375_v16 = vand.u32 %v1176_v15, %v365_v12 }
  0x85   : > { %976 = vmatpush3.bf16.xpose.msra.mxu0 %v311_v4 }
  0x86   : > { %993 = vmatprep.subr.bf16.mxu0 %v1084_v0  ;;  %982 = vmatpush3.bf16.msra.mxu1 %v375_v16 }
  0x87   : > { %987 = vmatprep.subr.bf16.mxu1 %v1084_v0  ;;  %v423_v20 = vpop.permute.xlu1 %422 }
  0x88   : > { %v428_v23 = vsel %vm306_vm1, %v423_v20, 0 }
  0x8b   : > { %v421_v21 = vpop.permute.xlu1 %420 }
  0x8c   : > { %978 = vmatmul.mubr.msk.bf16.vlgmr.msra.gmra.mxu0 %vm306_vm1, %v301_v6 }
  0x8d   : > { %995 = vmatprep.mubr.msk.bf16.mxu0 %vm1085_vm0, %v1084_v0 }
  0x8f   : > { %v533_v25 = vpop.permute.xlu1 %532 }
  0x90   : > { %v538_v27 = vsel %vm306_vm1, %v533_v25, 0 }
  0x93   : > { %v531_v26 = vpop.permute.xlu1 %530 }
  0x97   : > { %v643_v28 = vpop.permute.xlu1 %642 }
  0x98   : > { %v648_v29 = vsel %vm306_vm1, %v643_v28, 0 }
  0x9b   : > { %v641_v30 = vpop.permute.xlu1 %640 }
 0x14c   : > { %v347_v7 = vpop.f32.mrf.mxu0 }
 0x14d   : > { %v354_v8 = vsel %vm353_vm2, %v347_v7, -inf }
 0x14e   : > { %355 = vmax.xlane.f32.xlu0 %v354_v8  ;;  %v979_v9 = vpop.f32.mrf.mxu0 }
 0x150   : > { %v350_v10 = vpop.f32.mrf.mxu0 }
 0x152   : > { %v980_v11 = vpop.f32.mrf.mxu0 }
 0x164   : > { %480 = vrot.lane.b32.xlu0 %v1163_v2, %s1095_s15 }
 0x1d7   : > { %v356_v17 = vpop.xlane.xlu0 %355 }
 0x1d8   : > { %v357_v18 = vsub.f32 %v347_v7, %v356_v17 }
 0x1da   : > { %v358_v19 = vmul.f32 1.442695, %v357_v18  ;;  %v1057_v18 = vld [vmem:[%s1267_s2] sm:$0xff]  }
 0x1db   : > { %v481_v31 = vpop.permute.xlu0 %480 }
 0x1dc   : > { %1058 = vpow2.f32 %v358_v19  ;;  %v486_v32 = vand.u32 %v481_v31, %v1176_v15 }
 0x1de   : > { %994 = vmatpush3.bf16.msra.mxu0 %v486_v32 }
 0x1df   : > { %1005 = vmatprep.subr.bf16.mxu0 %v1084_v0 }
 0x1e9   : > { %v1181_v22 = vpop.eup %1058 }
 0x1ea   : > { %v363_v24 = vpack.c.bf16 %v1181_v22, %v1181_v22  ;;  %v360_v11 = vsel %vm353_vm2, %v1181_v22, 0.0 }
 0x1ec   : > { %984 = vmatmul.mubr.msk.bf16.vlgmr.msra.gmra.mxu1 %vm366_vm5, %v363_v24 }
 0x1ed   : > { %988 = vmatpush3.bf16.xpose.msra.mxu1 %v428_v23  ;;  %989 = vmatprep.mubr.msk.bf16.mxu1 %vm1085_vm0, %v1084_v0 }
 0x1ee   : > { %999 = vmatprep.subr.bf16.mxu1 %v1084_v0 }
 0x1f4   : > { %990 = vmatmul.mubr.msk.bf16.vlgmr.msra.gmra.mxu1 %vm306_vm1, %v421_v21 }
 0x1f5   : > { %1000 = vmatpush3.bf16.xpose.msra.mxu1 %v538_v27  ;;  %1001 = vmatprep.mubr.msk.bf16.mxu1 %vm1085_vm0, %v1084_v0 }
 0x1f6   : > { %1011 = vmatprep.subr.bf16.mxu1 %v1084_v0 }
 0x1fc   : > { %1002 = vmatmul.mubr.msk.bf16.vlgmr.msra.gmra.mxu1 %vm306_vm1, %v531_v26 }
 0x1fd   : > { %1012 = vmatpush3.bf16.xpose.msra.mxu1 %v648_v29  ;;  %1013 = vmatprep.mubr.msk.bf16.mxu1 %vm1085_vm0, %v1084_v0 }
 0x1fe   : > { %1023 = vmatprep.subr.bf16.mxu1 %v1084_v0 }
 0x204   : > { %1014 = vmatmul.mubr.msk.bf16.vlgmr.msra.gmra.mxu1 %vm306_vm1, %v641_v30 }
 0x205   : > { %1027 = vmatprep.mubr.msk.bf16.mxu1 %vm1085_vm0, %v1084_v0  ;;  %1024 = vmatpush3.bf16.msra.mxu1 %v1056_v14 }
 0x206   : > { %1025 = vmatprep.subr.bf16.mxu1 %v1084_v0 }
 0x209   : > { %1026 = vmatpush3.bf16.msra.mxu1 %v1057_v18 }
 0x2ac   : > { %v1205_v33 = vpop.f32.mrf.mxu1 }
 0x2ae   : > { %v985_v34 = vpop.f32.mrf.mxu1 }
 0x2b0   : > { %v414_v35 = vpop.f32.mrf.mxu1 }
 0x2b2   : > { %v986_v36 = vpop.f32.mrf.mxu1 }
 0x2b4   : > { %v464_v37 = vpop.f32.mrf.mxu1 }
 0x2b5   : > { %v470_v38 = vsel %vm353_vm2, %v464_v37, -inf }
 0x2b6   : > { %471 = vmax.xlane.f32.xlu1 %v470_v38  ;;  %v991_v39 = vpop.f32.mrf.mxu1 }
 0x2b8   : > { %v467_v40 = vpop.f32.mrf.mxu1 }
 0x2ba   : > { %v992_v41 = vpop.f32.mrf.mxu1 }
 0x2bc   : > { %v574_v42 = vpop.f32.mrf.mxu1 }
 0x2bd   : > { %v580_v43 = vsel %vm353_vm2, %v574_v42, -inf }
 0x2be   : > { %581 = vmax.xlane.f32.xlu0 %v580_v43  ;;  %v1003_v44 = vpop.f32.mrf.mxu1 }
 0x2c0   : > { %v577_v45 = vpop.f32.mrf.mxu1 }
 0x2c2   : > { %v1004_v46 = vpop.f32.mrf.mxu1 }
 0x2c3   : > { %v829_v46 = vld [vmem:[%s291_s30] sm:$0x1f] }
 0x2c4   : > { %v684_v47 = vpop.f32.mrf.mxu1 }
 0x2c5   : > { %v690_v48 = vsel %vm353_vm2, %v684_v47, -inf }
 0x2c6   : > { %691 = vmax.xlane.f32.xlu0 %v690_v48  ;;  %v1015_v49 = vpop.f32.mrf.mxu1 }
 0x2c7   : > { %590 = vrot.lane.b32.xlu1 %v1163_v2, %s1096_s16 }
 0x2c8   : > { %v687_v50 = vpop.f32.mrf.mxu1 }
 0x2ca   : > { %v1016_v51 = vpop.f32.mrf.mxu1 }
 0x2dc   : > { %700 = vrot.lane.b32.xlu0 %v1163_v2, %s1097_s17 }
 0x33f   : > { %v472_v52 = vpop.xlane.xlu1 %471 }
 0x340   : > { %v473_v53 = vsub.f32 %v464_v37, %v472_v52 }
 0x342   : > { %v474_v54 = vmul.f32 1.442695, %v473_v53 }
 0x343   : > { %v591_v58 = vpop.permute.xlu1 %590 }
 0x344   : > { %1060 = vpow2.f32 %v474_v54  ;;  %v596_v62 = vand.u32 %v591_v58, %v1176_v15 }
 0x347   : > { %v582_v55 = vpop.xlane.xlu0 %581 }
 0x348   : > { %v583_v56 = vsub.f32 %v574_v42, %v582_v55 }
 0x34a   : > { %v584_v57 = vmul.f32 1.442695, %v583_v56 }
 0x34c   : > { %1062 = vpow2.f32 %v584_v57 }
 0x34f   : > { %v692_v59 = vpop.xlane.xlu0 %691 }
 0x350   : > { %v693_v60 = vsub.f32 %v684_v47, %v692_v59 }
 0x351   : > { %v1061_v61 = vpop.eup %1060 }
 0x352   : > { %v694_v63 = vmul.f32 1.442695, %v693_v60  ;;  %v476_v1 = vsel %vm353_vm2, %v1061_v61, 0.0  ;;  %v479_v3 = vpack.c.bf16 %v1061_v61, %v1061_v61 }
 0x353   : > { %477 = vadd.xlane.f32.xlu0 %v476_v1  ;;  %v701_v2 = vpop.permute.xlu0 %700  ;;  %v834_v1 = vld [vmem:[%s1270_s5] sm:$0x1] }
 0x354   : > { %1064 = vpow2.f32 %v694_v63  ;;  %996 = vmatmul.mubr.msk.bf16.vlgmr.msra.gmra.mxu0 %vm366_vm5, %v479_v3  ;;  %v706_v5 = vand.u32 %v701_v2, %v1176_v15 }
 0x355   : > { %1006 = vmatpush3.bf16.msra.mxu0 %v596_v62  ;;  %1007 = vmatprep.mubr.msk.bf16.mxu0 %vm1085_vm0, %v1084_v0  ;;  %v833_v62 = vld [vmem:[%s1269_s4] sm:$0x1] }
 0x356   : > { %1017 = vmatprep.subr.bf16.mxu0 %v1084_v0 }
 0x359   : > { %v1063_v4 = vpop.eup %1062 }
 0x35a   : > { %v586_v6 = vsel %vm353_vm2, %v1063_v4, 0.0  ;;  %v589_v7 = vpack.c.bf16 %v1063_v4, %v1063_v4 }
 0x35b   : > { %587 = vadd.xlane.f32.xlu1 %v586_v6 }
 0x35c   : > { %1008 = vmatmul.mubr.msk.bf16.vlgmr.msra.gmra.mxu0 %vm366_vm5, %v589_v7 }
 0x35d   : > { %1018 = vmatpush3.bf16.msra.mxu0 %v706_v5  ;;  %1019 = vmatprep.mubr.msk.bf16.mxu0 %vm1085_vm0, %v1084_v0 }
 0x361   : > { %v1065_v8 = vpop.eup %1064 }
 0x362   : > { %v696_v9 = vsel %vm353_vm2, %v1065_v8, 0.0  ;;  %v699_v10 = vpack.c.bf16 %v1065_v8, %v1065_v8 }
 0x363   : > { %697 = vadd.xlane.f32.xlu0 %v696_v9 }
 0x364   : > { %1020 = vmatmul.mubr.msk.bf16.vlgmr.msra.gmra.mxu0 %vm366_vm5, %v699_v10 }
 0x367   : > { %361 = vadd.xlane.f32.xlu0 %v360_v11 }
 0x3dc   : > { %v478_v12 = vpop.xlane.xlu0 %477 }
 0x3dd   : > { %1066 = vrcp.f32 %v478_v12 }
 0x3e4   : > { %v588_v13 = vpop.xlane.xlu1 %587 }
 0x3e5   : > { %1068 = vrcp.f32 %v588_v13 }
 0x3ea   : > { %v1067_v15 = vpop.eup %1066 }
 0x3ec   : > { %v698_v16 = vpop.xlane.xlu0 %697 }
 0x3ed   : > { %1070 = vrcp.f32 %v698_v16 }
 0x3f0   : > { %v362_v35 = vpop.xlane.xlu0 %361 }
 0x3f1   : > { %1072 = vrcp.f32 %v362_v35 }
 0x3f2   : > { %v1069_v23 = vpop.eup %1068 }
 0x3fa   : > { %v1071_v29 = vpop.eup %1070 }
 0x3fe   : > { %v1073_v36 = vpop.eup %1072 }
 0x3ff   : > { %v418_v38 = vmul.f32 %v1073_v36, %v1205_v33  ;;  %v772_v33 = vld [vmem:[%s1268_s3] sm:$0x1] }
 0x414   : > { %v522_v17 = vpop.f32.mrf.mxu0 }
 0x415   : > { %v529_v19 = vmul.f32 %v1067_v15, %v522_v17 }
 0x416   : > { %v997_v20 = vpop.f32.mrf.mxu0 }
 0x417   : > { %751 = vrot.lane.b32.xlu0 %v529_v19, %s1098_s22 }
 0x418   : > { %v525_v21 = vpop.f32.mrf.mxu0 }
 0x41a   : > { %v998_v22 = vpop.f32.mrf.mxu0 }
 0x41c   : > { %v632_v24 = vpop.f32.mrf.mxu0 }
 0x41d   : > { %v639_v25 = vmul.f32 %v1069_v23, %v632_v24 }
 0x41e   : > { %v1009_v26 = vpop.f32.mrf.mxu0 }
 0x41f   : > { %755 = vrot.lane.b32.xlu1 %v639_v25, %s1099_s23 }
 0x420   : > { %v635_v27 = vpop.f32.mrf.mxu0 }
 0x422   : > { %v1010_v28 = vpop.f32.mrf.mxu0 }
 0x424   : > { %v742_v30 = vpop.f32.mrf.mxu0 }
 0x425   : > { %v749_v31 = vmul.f32 %v1071_v29, %v742_v30 }
 0x426   : > { %v1021_v32 = vpop.f32.mrf.mxu0 }
 0x427   : > { %759 = vrot.lane.b32.xlu0 %v749_v31, %s1100_s27 }
 0x428   : > { %v745_v0 = vpop.f32.mrf.mxu0 }
 0x42a   : > { %v1022_v34 = vpop.f32.mrf.mxu0 }
 0x489   : > { %v752_v37 = vpop.permute.xlu0 %751 }
 0x48a   : > { %v762_v40 = vsel %vm306_vm1, %v418_v38, %v752_v37 }
 0x491   : > { %v756_v39 = vpop.permute.xlu1 %755 }
 0x492   : > { %v764_v41 = vsel %vm763_vm6, %v762_v40, %v756_v39 }
 0x499   : > { %v760_v42 = vpop.permute.xlu0 %759 }
 0x49a   : > { %v766_v43 = vsel %vm765_vm7, %v764_v41, %v760_v42 }
 0x49b   : > { %v767_v44 = vpack.c.bf16 %v766_v43, %v766_v43 }
 0x49d   : > { %1028 = vmatmul.mubr.msk.bf16.vlgmr.msra.gmra.mxu1 %vm785_vm8, %v767_v44 }
 0x55d   : > { %v823_v45 = vpop.f32.mrf.mxu1 }
 0x55e   : > { %v824_v47 = vadd.f32 %v823_v45, %v772_v33 }
 0x55f   : > { %v1029_v48 = vpop.f32.mrf.mxu1 }
 0x560   : > { %v830_v49 = vadd.f32 %v829_v46, %v824_v47 }
 0x561   : > { %v826_v50 = vpop.f32.mrf.mxu1 }
 0x562   : > { %v835_v51 = vsel %vm831_vm9, %v830_v49, 0.0  ;;  %832 = vst.msk [vmem:[%s297_s12] sm:$0x1] %vm831_vm9, %v830_v49 }
 0x563   : > { %836 = vadd.xlane.f32.xlu0 %v835_v51  ;;  %v1030_v52 = vpop.f32.mrf.mxu1 }
 0x5ec   : > { %v837_v53 = vpop.xlane.xlu0 %836 }
 0x5ed   : > { %v839_v54 = vmul.f32 0.03125, %v837_v53 }
 0x5ef   : > { %v840_v55 = vsub.f32 %v830_v49, %v839_v54 }
 0x5f1   : > { %v841_v56 = vmul.f32 %v840_v55, %v840_v55 }
 0x5f3   : > { %v842_v57 = vsel %vm831_vm9, %v841_v56, 0.0 }
 0x5f4   : > { %843 = vadd.xlane.f32.xlu1 %v842_v57 }
 0x67d   : > { %v844_v58 = vpop.xlane.xlu1 %843 }
 0x67e   : > { %v845_v59 = vmul.f32 0.03125, %v844_v58 }
 0x680   : > { %v846_v60 = vadd.f32 1e-06, %v845_v59 }
 0x682   : > { %1074 = vrsqrt.f32 %v846_v60 }
 0x68f   : > { %v1075_v61 = vpop.eup %1074 }
 0x690   : > { %v848_v63 = vmul.f32 %v1075_v61, %v840_v55 }
 0x692   : > { %v849_v3 = vmul.f32 %v848_v63, %v833_v62 }
 0x694   : > { %v850_v2 = vadd.f32 %v849_v3, %v834_v1 }
 0x696   : > { %851 = vst.msk [vmem:[%s294_s18] sm:$0x1] %vm831_vm9, %v850_v2 }
 0x697 PF: > { %s18_s24 = sadd.s32 1, %s1082_s24  }
 0x698   : > { %p15_p4 = scmp.ge.s32.totalorder %s18_s24, 4  }
 0x69a   :  { %17 = sbr.rel (!%p15_p4) target bundleno = 1 (0x1), region = 89 }

// kernel: _lambda_.15
= control target key start
LH: loop header
LB: loop body
LE: loop exit
PB: predicated region body
PF: predicated region fallthrough
CT: control target
= control target key end

     0   :  { %13 = vsyncpa [#allocation3], 0  ;;  %vm31_vm0 = vcmask 254976   ;;  %s301_s0 = inlined_call_operand.vmem [shape: f32[2,32], index: 0, kind: input, shape index: {}]   ;;  %s302_s1 = inlined_call_operand.vmem [shape: f32[2,32], index: 1, kind: input, shape index: {}]   ;;  %s303_s2 = inlined_call_operand.vmem [shape: f32[1,32], index: 2, kind: input, shape index: {}]   ;;  %s304_s3 = inlined_call_operand.vmem [shape: f32[1,32], index: 3, kind: input, shape index: {}]   ;;  %s305_s4 = inlined_call_operand.vmem [shape: bf16[32,8], index: 4, kind: input, shape index: {}]   ;;  %s306_s5 = inlined_call_operand.vmem [shape: f32[1,8], index: 5, kind: input, shape index: {}]   ;;  %s307_s6 = inlined_call_operand.hbm [shape: f32[2,8], index: 6, kind: output, shape index: {0}]   ;;  %s308_s7 = inlined_call_operand.hbm [shape: f32[2,32], index: 7, kind: output, shape index: {1}]  }
   0x1   :  { %v28_v0 = vld [vmem:[%s301_s0] sm:$0x3] }
   0x2   :  { %v29_v1 = vld [vmem:[%s302_s1] sm:$0x3] }
   0x3   :  { %v30_v2 = vadd.f32 %v29_v1, %v28_v0 }
   0x4   :  { %14 = vsyncpa [#allocation5], 0  ;;  %v182_v9 = vld [vmem:[%s305_s4 + $0x8] sm:$0xff]   ;;  %v230_v10 = vmov 0.0   ;;  %vm231_vm1 = vmmov 0   ;;  %v183_v11 = vld [vmem:[%s305_s4] sm:$0xff]  }
   0x5   :  { %v35_v3 = vsel %vm31_vm0, %v30_v2, 0.0  ;;  %32 = vst.msk [vmem:[#allocation4] sm:$0x3] %vm31_vm0, %v30_v2  ;;  %170 = vmatprep.subr.bf16.mxu0 %v230_v10  ;;  %174 = vmatprep.mubr.msk.bf16.mxu0 %vm231_vm1, %v230_v10  ;;  %v161_v16 = vld [vmem:[%s303_s2] ss:$0 sm:$0xff]  ;;  %vm87_vm2 = vcmask 261120  }
   0x6   :  { %36 = vadd.xlane.f32.xlu0 %v35_v3  ;;  %171 = vmatpush3.bf16.msra.mxu0 %v182_v9  ;;  %v162_v18 = vld [vmem:[%s304_s3] ss:$0 sm:$0xff]  ;;  %s232_s4 = smov [#allocation4]  }
   0x7   :  { %172 = vmatprep.subr.bf16.mxu0 %v230_v10  ;;  %s149_s11 = sshll.u32 %s232_s4, 4  ;;  %s150_s11 = int_to_ptr.vmem [resolvable:$true] %s149_s11 }
   0x8   :  { %s186_s12 = scalar_lea.vmem %s150_s11, 32  ;;  %p191_p1 = scmp.lt.s32.totalorder %s150_s11, %s150_s11 }
   0x9   :  { %p187_p0 = scmp.ne.s32.totalorder %s150_s11, %s186_s12  ;;  %p192_p2 = scmp.lt.s32.totalorder %s186_s12, %s186_s12 }
   0xa   :  { %173 = vmatpush3.bf16.msra.mxu0 %v183_v11 }
   0xb   :  { %p193_p3 = por %p192_p2, %p191_p1 }
   0xd   :  { %p194_p4 = pnand %p193_p3, %p187_p0 }
  0x8f   :  { %v37_v4 = vpop.xlane.xlu0 %36 }
  0x90   :  { %v39_v5 = vmul.f32 0.03125, %v37_v4 }
  0x92   :  { %v40_v6 = vsub.f32 %v30_v2, %v39_v5 }
  0x94   :  { %v41_v7 = vmul.f32 %v40_v6, %v40_v6 }
  0x96   :  { %v42_v8 = vsel %vm31_vm0, %v41_v7, 0.0 }
  0x97   :  { %43 = vadd.xlane.f32.xlu0 %v42_v8 }
 0x120   :  { %v44_v12 = vpop.xlane.xlu0 %43 }
 0x121   :  { %v45_v13 = vmul.f32 0.03125, %v44_v12 }
 0x123   :  { %v46_v14 = vadd.f32 1e-06, %v45_v13 }
 0x125   :  { %184 = vrsqrt.f32 %v46_v14 }
 0x132   :  { %v185_v15 = vpop.eup %184 }
 0x133   :  { %v48_v17 = vmul.f32 %v185_v15, %v40_v6 }
 0x135   :  { %v55_v19 = vmul.f32 %v161_v16, %v48_v17 }
 0x137   :  { %v62_v20 = vadd.f32 %v162_v18, %v55_v19 }
 0x139   :  { %v63_v21 = vpack.c.bf16 %v62_v20, %v62_v20 }
 0x13b   :  { %175 = vmatmul.mubr.msk.bf16.vlgmr.msra.gmra.mxu0 %vm87_vm2, %v63_v21 }
 0x13c   :  { %197 = shalt.err (!%p194_p4)
}
 0x13d   :  { %152 = dma.vmem_to_hbm [thread:$0]  %s150_s11, 32, %s308_s7, [#allocation5]   ;;  %v163_v22 = vld [vmem:[%s306_s5] ss:$0 sm:$0xff]  ;;  %vm131_vm3 = vcmask 58368  }
 0x13e   :  { %s233_s15 = smov [#allocation2]  }
 0x13f   :  { %s139_s16 = sshll.u32 %s233_s15, 4  ;;  %s140_s16 = int_to_ptr.vmem [resolvable:$true] %s139_s16 }
 0x140   :  { %s206_s17 = scalar_lea.vmem %s140_s16, 32  ;;  %p211_p6 = scmp.lt.s32.totalorder %s140_s16, %s140_s16 }
 0x141   :  { %p207_p5 = scmp.ne.s32.totalorder %s140_s16, %s206_s17  ;;  %p212_p7 = scmp.lt.s32.totalorder %s206_s17, %s206_s17 }
 0x143   :  { %p213_p8 = por %p212_p7, %p211_p6 }
 0x145   :  { %p214_p9 = pnand %p213_p8, %p207_p5 }
 0x1fb   :  { %v125_v23 = vpop.f32.mrf.mxu0 }
 0x1fc   :  { %v126_v24 = vadd.f32 %v163_v22, %v125_v23 }
 0x1fd   :  { %v176_v25 = vpop.f32.mrf.mxu0 }
 0x1fe   :  { %132 = vst.msk [vmem:[#allocation2] sm:$0x3] %vm131_vm3, %v126_v24 }
 0x1ff   :  { %v128_v26 = vpop.f32.mrf.mxu0 }
 0x200   :  { %217 = shalt.err (!%p214_p9)
}
 0x201   :  { %142 = dma.vmem_to_hbm [thread:$0]  %s140_s16, 32, %s307_s6, [#allocation3]   ;;  %v177_v27 = vpop.f32.mrf.mxu0 }
 0x202   :  { %226 = dma.done.wait [#allocation3], 32  }
 0x203   :  { %227 = vsyncadd [#allocation3], 4294967264 }
 0x204   :  { %228 = dma.done.wait [#allocation5], 32  }
 0x205   :  { %229 = vsyncadd [#allocation5], 4294967264 }
 0x206   :  { %159 = vsyncpa [#allocation3], 1 }
 0x207   :  { %160 = vsyncpa [#allocation5], 1 }

</bundles_post_ra>
